<compile_context>
chip_gen: v5e
topology: v5e:2x2
jax: 0.10.0
libtpu: 0.0.40
codegen_flags: <defaults>
</compile_context>

<pallas_src>
import functools

import jax
import jax.numpy as jnp
import numpy as np
from jax import lax
from jax.experimental import pallas as pl
from jax.experimental.pallas import tpu as pltpu


def _facemesh_block_kernel(x_ref, w_ref, o_ref, *, H, W, Cin, Cout, N):
    """Fused (dw3x3 -> pw1x1 -> bias -> +residual/channel-pad -> PReLU).

    Whole batch handled in a single invocation (no per-image grid steps).

    x_ref: (N*Cin, H*W)   flattened images, batch stacked along sublanes
    w_ref: (Cout, 128)    lanes [0, 9*Cin)  : fused dense 3x3 weights,
                            tap index t = (kh*3 + kw)*Cin + ci
                          lane 9*Cin        : fused bias
                          lane 9*Cin + 1    : PReLU negative slope
                          remaining lanes   : zero padding
    o_ref: (N*Cout, H*W)
    """
    HW = H * W

    # ---- hoisted boundary masks (lane index == flat position inside image) ----
    flat = lax.broadcasted_iota(jnp.int32, (1, HW), 1)
    if W & (W - 1) == 0:                          # cheap pow2 column index
        col = jnp.bitwise_and(flat, W - 1)
    else:
        col = flat % W
    ok_left = col > 0                             # dx = -1 valid lanes
    ok_right = col < (W - 1)                      # dx = +1 valid lanes
    ok_top = flat >= W                            # dy = -1 valid lanes
    ok_bot = flat < (HW - W)                      # dy = +1 valid lanes

    x = x_ref[...]                                # (N*Cin, HW)
    bias = w_ref[:, 9 * Cin:9 * Cin + 1]          # (Cout, 1)
    alpha = w_ref[:, 9 * Cin + 1:9 * Cin + 2]     # (Cout, 1)

    # Per-image accumulators initialised with the fused bias (hoisted broadcast).
    accs = [jnp.broadcast_to(bias, (Cout, HW)) for _ in range(N)]

    # Dense 3x3 conv (dw + pw + residual folded) as 9 static lane rotations
    # (XLU) and N*9*Cin broadcast multiply-adds (VPU).  No wrapper pad: the
    # roll wrap-around only ever lands on lanes that the masks zero out.
    for kh in range(3):
        dy = kh - 1
        for kw in range(3):
            dx = kw - 1
            off = dy * W + dx
            shifted = x if off == 0 else pltpu.roll(x, (-off) % HW, 1)
            mask = None
            if dy == -1:
                mask = ok_top
            elif dy == 1:
                mask = ok_bot
            if dx == -1:
                mask = ok_left if mask is None else jnp.logical_and(mask, ok_left)
            elif dx == 1:
                mask = ok_right if mask is None else jnp.logical_and(mask, ok_right)
            tap = shifted if mask is None else jnp.where(mask, shifted, 0.0)

            for ci in range(Cin):
                t = (kh * 3 + kw) * Cin + ci
                w_col = w_ref[:, t:t + 1]                     # (Cout, 1)
                for n in range(N):
                    row = n * Cin + ci
                    # (Cout, 1) * (1, HW) -> (Cout, HW)
                    accs[n] = accs[n] + w_col * tap[row:row + 1, :]

    # PReLU and lane-dense stores (HW is a multiple of 128 in the harness).
    for n in range(N):
        a = accs[n]
        o_ref[n * Cout:(n + 1) * Cout, :] = jnp.where(a >= 0, a, alpha * a)


def facemesh_block(x_nchw, dw_w, dw_b, pw_w, pw_b, prelu_w):
    """FaceMeshBlock forward, stride=1, kernel_size=3.

    x_nchw : (N, Cin, H, W)    float32 (PyTorch layout)
    dw_w   : (Cin, 1, 3, 3)    depthwise conv weight
    dw_b   : (Cin,)
    pw_w   : (Cout, Cin, 1, 1) pointwise conv weight
    pw_b   : (Cout,)
    prelu_w: (Cout,)
    returns (N, Cout, H, W)
    """
    N, Cin, H, W = x_nchw.shape
    Cout = pw_w.shape[0]
    assert Cout >= Cin, "FaceMeshBlock requires out_channels >= in_channels"
    HW = H * W

    # ---- glue: pure reshapes only (no pad, no transpose of activations) ----
    x2d = x_nchw.reshape(N * Cin, HW).astype(jnp.float32)

    # Fold dw3x3 + pw1x1 + both biases + residual/channel-pad into one dense 3x3:
    #   w_eff[kh,kw,ci,co] = dw[ci,kh,kw] * pw[co,ci];  w_eff[1,1,ci,ci] += 1
    #   b_eff[co] = pw_b[co] + sum_ci pw[co,ci] * dw_b[ci]
    dwt = jnp.transpose(dw_w[:, 0, :, :], (1, 2, 0)).astype(jnp.float32)   # (3,3,Cin)
    pw_t = jnp.transpose(pw_w[:, :, 0, 0], (1, 0)).astype(jnp.float32)     # (Cin,Cout)
    w_eff = dwt[:, :, :, None] * pw_t[None, None, :, :]                    # (3,3,Cin,Cout)
    ident = (jnp.arange(Cin)[:, None] == jnp.arange(Cout)[None, :]).astype(jnp.float32)
    w_eff = w_eff.at[1, 1].add(ident)
    b_eff = pw_b.astype(jnp.float32) + jnp.sum(
        pw_t * dw_b.astype(jnp.float32)[:, None], axis=0)                  # (Cout,)

    # Single dense (Cout, 128) parameter tile: weights + bias + PReLU slope.
    NLANES = 128
    assert 9 * Cin + 2 <= NLANES, "parameter tile needs more than 128 lanes"
    w_tile = jnp.zeros((Cout, NLANES), jnp.float32)
    w_tile = w_tile.at[:, :9 * Cin].set(jnp.transpose(w_eff.reshape(9 * Cin, Cout)))
    w_tile = w_tile.at[:, 9 * Cin].set(b_eff)
    w_tile = w_tile.at[:, 9 * Cin + 1].set(prelu_w.astype(jnp.float32))

    kernel = functools.partial(_facemesh_block_kernel,
                               H=H, W=W, Cin=Cin, Cout=Cout, N=N)

    out2d = pl.pallas_call(
        kernel,
        out_shape=jax.ShapeDtypeStruct((N * Cout, HW), jnp.float32),
        grid=(1,),
        in_specs=[
            pl.BlockSpec((N * Cin, HW), lambda i: (0, 0)),
            pl.BlockSpec((Cout, NLANES), lambda i: (0, 0)),
        ],
        out_specs=pl.BlockSpec((N * Cout, HW), lambda i: (0, 0)),
        compiler_params=pltpu.CompilerParams(
            dimension_semantics=("arbitrary",)),
    )(x2d, w_tile)

    return out2d.reshape(N, Cout, H, W)                       # already NCHW


def facemesh_block_reference(x_nchw, dw_w, dw_b, pw_w, pw_b, prelu_w):
    """Pure-JAX reference (lax.conv) for verification."""
    N, Cin, H, W = x_nchw.shape
    Cout = pw_w.shape[0]
    x = jnp.transpose(x_nchw, (0, 2, 3, 1))                   # NHWC
    dn = ('NHWC', 'HWIO', 'NHWC')
    dw_rhs = jnp.transpose(dw_w, (2, 3, 1, 0))                # (3,3,1,Cin)
    h = lax.conv_general_dilated(x, dw_rhs, (1, 1), ((1, 1), (1, 1)),
                                 dimension_numbers=dn,
                                 feature_group_count=Cin) + dw_b
    pw_rhs = jnp.transpose(pw_w, (2, 3, 1, 0))                # (1,1,Cin,Cout)
    y = lax.conv_general_dilated(h, pw_rhs, (1, 1), ((0, 0), (0, 0)),
                                 dimension_numbers=dn) + pw_b
    xres = jnp.pad(x, ((0, 0), (0, 0), (0, 0), (0, Cout - Cin)))
    y = y + xres
    y = jnp.where(y >= 0, y, prelu_w * y)
    return jnp.transpose(y, (0, 3, 1, 2))


if __name__ == "__main__":
    # Small shapes: batch=2, in_channels=4, out_channels=8, spatial=16x16.
    N, Cin, Cout, H, W = 2, 4, 8, 16, 16

    key = jax.random.PRNGKey(0)
    k1, k2, k3, k4, k5, k6 = jax.random.split(key, 6)

    x = jax.random.normal(k1, (N, Cin, H, W), dtype=jnp.float32)
    dw_w = jax.random.normal(k2, (Cin, 1, 3, 3), dtype=jnp.float32) * 0.1
    dw_b = jax.random.normal(k3, (Cin,), dtype=jnp.float32) * 0.1
    pw_w = jax.random.normal(k4, (Cout, Cin, 1, 1), dtype=jnp.float32) * 0.1
    pw_b = jax.random.normal(k5, (Cout,), dtype=jnp.float32) * 0.1
    # PyTorch default PReLU init is 0.25; perturb per-channel deterministically.
    prelu_w = 0.25 + 0.05 * jax.random.normal(k6, (Cout,), dtype=jnp.float32)

    out = facemesh_block(x, dw_w, dw_b, pw_w, pw_b, prelu_w)
    out = jax.block_until_ready(out)

    ref = facemesh_block_reference(x, dw_w, dw_b, pw_w, pw_b, prelu_w)
    ref = jax.block_until_ready(ref)

    assert out.shape == (N, Cout, H, W), out.shape
    np.testing.assert_allclose(np.asarray(out), np.asarray(ref),
                               rtol=2e-4, atol=2e-5)
    print("KERNEL_OK")
</pallas_src>

<mosaic_0001>
module attributes {stable_mosaic.version = 11 : i64} {
  func.func @_facemesh_block_kernel(%arg0: i32, %arg1: memref<8x256xf32, #tpu.memory_space<vmem>>, %arg2: memref<8x128xf32, #tpu.memory_space<vmem>>, %arg3: memref<16x256xf32, #tpu.memory_space<vmem>>) attributes {dimension_semantics = [#tpu.dimension_semantics<arbitrary>], iteration_bounds = array<i64: 1>, scalar_prefetch = 0 : i64, scratch_operands = 0 : i64, tpu.core_type = #tpu.core_type<tc>, window_params = [{pipeline_mode = #tpu.pipeline_mode<synchronous>, transform_indices = @transform_0, window_bounds = array<i64: 8, 256>}, {pipeline_mode = #tpu.pipeline_mode<synchronous>, transform_indices = @transform_1, window_bounds = array<i64: 8, 128>}, {pipeline_mode = #tpu.pipeline_mode<synchronous>, transform_indices = @transform_2, window_bounds = array<i64: 16, 256>}]} {
    %0 = tpu.iota {dimensions = array<i32: 1>} : vector<1x256xi32>
    %c15_i32 = arith.constant 15 : i32
    %1 = vector.broadcast %c15_i32 : i32 to vector<1x256xi32>
    %2 = arith.andi %0, %1 : vector<1x256xi32>
    %c0_i32 = arith.constant 0 : i32
    %3 = vector.broadcast %c0_i32 : i32 to vector<1x256xi32>
    %4 = arith.cmpi sgt, %2, %3 : vector<1x256xi32>
    %c15_i32_0 = arith.constant 15 : i32
    %5 = vector.broadcast %c15_i32_0 : i32 to vector<1x256xi32>
    %6 = arith.cmpi slt, %2, %5 : vector<1x256xi32>
    %c16_i32 = arith.constant 16 : i32
    %7 = vector.broadcast %c16_i32 : i32 to vector<1x256xi32>
    %8 = arith.cmpi sge, %0, %7 : vector<1x256xi32>
    %c240_i32 = arith.constant 240 : i32
    %9 = vector.broadcast %c240_i32 : i32 to vector<1x256xi32>
    %10 = arith.cmpi slt, %0, %9 : vector<1x256xi32>
    %c0 = arith.constant 0 : index
    %c0_1 = arith.constant 0 : index
    %11 = vector.load %arg1[%c0, %c0_1] : memref<8x256xf32, #tpu.memory_space<vmem>>, vector<8x256xf32>
    %c0_2 = arith.constant 0 : index
    %c36 = arith.constant 36 : index
    %12 = vector.load %arg2[%c0_2, %c36] : memref<8x128xf32, #tpu.memory_space<vmem>>, vector<8x1xf32>
    %c0_3 = arith.constant 0 : index
    %c37 = arith.constant 37 : index
    %13 = vector.load %arg2[%c0_3, %c37] : memref<8x128xf32, #tpu.memory_space<vmem>>, vector<8x1xf32>
    %14 = vector.shape_cast %12 : vector<8x1xf32> to vector<8x1xf32>
    %15 = vector.broadcast %14 : vector<8x1xf32> to vector<8x256xf32>
    %16 = vector.shape_cast %12 : vector<8x1xf32> to vector<8x1xf32>
    %17 = vector.broadcast %16 : vector<8x1xf32> to vector<8x256xf32>
    %c17_i32 = arith.constant 17 : i32
    %18 = tpu.dynamic_rotate %11 by %c17_i32 dim 1 : vector<8x256xf32>, i32 -> vector<8x256xf32>
    %19 = arith.andi %8, %4 : vector<1x256xi1>
    %cst = arith.constant 0.000000e+00 : f32
    %20 = vector.shape_cast %19 : vector<1x256xi1> to vector<1x256xi1>
    %21 = vector.broadcast %20 : vector<1x256xi1> to vector<8x256xi1>
    %22 = vector.broadcast %cst : f32 to vector<8x256xf32>
    %23 = arith.select %21, %18, %22 : vector<8x256xi1>, vector<8x256xf32>
    %c0_4 = arith.constant 0 : index
    %c0_5 = arith.constant 0 : index
    %24 = vector.load %arg2[%c0_4, %c0_5] : memref<8x128xf32, #tpu.memory_space<vmem>>, vector<8x1xf32>
    %25 = vector.extract_strided_slice %23 {offsets = [0, 0], sizes = [1, 256], strides = [1, 1]} : vector<8x256xf32> to vector<1x256xf32>
    %26 = vector.broadcast %24 : vector<8x1xf32> to vector<8x256xf32>
    %27 = vector.broadcast %25 : vector<1x256xf32> to vector<8x256xf32>
    %28 = arith.mulf %26, %27 : vector<8x256xf32>
    %29 = arith.addf %15, %28 : vector<8x256xf32>
    %30 = vector.extract_strided_slice %23 {offsets = [4, 0], sizes = [1, 256], strides = [1, 1]} : vector<8x256xf32> to vector<1x256xf32>
    %31 = vector.broadcast %24 : vector<8x1xf32> to vector<8x256xf32>
    %32 = vector.broadcast %30 : vector<1x256xf32> to vector<8x256xf32>
    %33 = arith.mulf %31, %32 : vector<8x256xf32>
    %34 = arith.addf %17, %33 : vector<8x256xf32>
    %c0_6 = arith.constant 0 : index
    %c1 = arith.constant 1 : index
    %35 = vector.load %arg2[%c0_6, %c1] : memref<8x128xf32, #tpu.memory_space<vmem>>, vector<8x1xf32>
    %36 = vector.extract_strided_slice %23 {offsets = [1, 0], sizes = [1, 256], strides = [1, 1]} : vector<8x256xf32> to vector<1x256xf32>
    %37 = vector.broadcast %35 : vector<8x1xf32> to vector<8x256xf32>
    %38 = vector.broadcast %36 : vector<1x256xf32> to vector<8x256xf32>
    %39 = arith.mulf %37, %38 : vector<8x256xf32>
    %40 = arith.addf %29, %39 : vector<8x256xf32>
    %41 = vector.extract_strided_slice %23 {offsets = [5, 0], sizes = [1, 256], strides = [1, 1]} : vector<8x256xf32> to vector<1x256xf32>
    %42 = vector.broadcast %35 : vector<8x1xf32> to vector<8x256xf32>
    %43 = vector.broadcast %41 : vector<1x256xf32> to vector<8x256xf32>
    %44 = arith.mulf %42, %43 : vector<8x256xf32>
    %45 = arith.addf %34, %44 : vector<8x256xf32>
    %c0_7 = arith.constant 0 : index
    %c2 = arith.constant 2 : index
    %46 = vector.load %arg2[%c0_7, %c2] : memref<8x128xf32, #tpu.memory_space<vmem>>, vector<8x1xf32>
    %47 = vector.extract_strided_slice %23 {offsets = [2, 0], sizes = [1, 256], strides = [1, 1]} : vector<8x256xf32> to vector<1x256xf32>
    %48 = vector.broadcast %46 : vector<8x1xf32> to vector<8x256xf32>
    %49 = vector.broadcast %47 : vector<1x256xf32> to vector<8x256xf32>
    %50 = arith.mulf %48, %49 : vector<8x256xf32>
    %51 = arith.addf %40, %50 : vector<8x256xf32>
    %52 = vector.extract_strided_slice %23 {offsets = [6, 0], sizes = [1, 256], strides = [1, 1]} : vector<8x256xf32> to vector<1x256xf32>
    %53 = vector.broadcast %46 : vector<8x1xf32> to vector<8x256xf32>
    %54 = vector.broadcast %52 : vector<1x256xf32> to vector<8x256xf32>
    %55 = arith.mulf %53, %54 : vector<8x256xf32>
    %56 = arith.addf %45, %55 : vector<8x256xf32>
    %c0_8 = arith.constant 0 : index
    %c3 = arith.constant 3 : index
    %57 = vector.load %arg2[%c0_8, %c3] : memref<8x128xf32, #tpu.memory_space<vmem>>, vector<8x1xf32>
    %58 = vector.extract_strided_slice %23 {offsets = [3, 0], sizes = [1, 256], strides = [1, 1]} : vector<8x256xf32> to vector<1x256xf32>
    %59 = vector.broadcast %57 : vector<8x1xf32> to vector<8x256xf32>
    %60 = vector.broadcast %58 : vector<1x256xf32> to vector<8x256xf32>
    %61 = arith.mulf %59, %60 : vector<8x256xf32>
    %62 = arith.addf %51, %61 : vector<8x256xf32>
    %63 = vector.extract_strided_slice %23 {offsets = [7, 0], sizes = [1, 256], strides = [1, 1]} : vector<8x256xf32> to vector<1x256xf32>
    %64 = vector.broadcast %57 : vector<8x1xf32> to vector<8x256xf32>
    %65 = vector.broadcast %63 : vector<1x256xf32> to vector<8x256xf32>
    %66 = arith.mulf %64, %65 : vector<8x256xf32>
    %67 = arith.addf %56, %66 : vector<8x256xf32>
    %c16_i32_9 = arith.constant 16 : i32
    %68 = tpu.dynamic_rotate %11 by %c16_i32_9 dim 1 : vector<8x256xf32>, i32 -> vector<8x256xf32>
    %cst_10 = arith.constant 0.000000e+00 : f32
    %69 = vector.shape_cast %8 : vector<1x256xi1> to vector<1x256xi1>
    %70 = vector.broadcast %69 : vector<1x256xi1> to vector<8x256xi1>
    %71 = vector.broadcast %cst_10 : f32 to vector<8x256xf32>
    %72 = arith.select %70, %68, %71 : vector<8x256xi1>, vector<8x256xf32>
    %c0_11 = arith.constant 0 : index
    %c4 = arith.constant 4 : index
    %73 = vector.load %arg2[%c0_11, %c4] : memref<8x128xf32, #tpu.memory_space<vmem>>, vector<8x1xf32>
    %74 = vector.extract_strided_slice %72 {offsets = [0, 0], sizes = [1, 256], strides = [1, 1]} : vector<8x256xf32> to vector<1x256xf32>
    %75 = vector.broadcast %73 : vector<8x1xf32> to vector<8x256xf32>
    %76 = vector.broadcast %74 : vector<1x256xf32> to vector<8x256xf32>
    %77 = arith.mulf %75, %76 : vector<8x256xf32>
    %78 = arith.addf %62, %77 : vector<8x256xf32>
    %79 = vector.extract_strided_slice %72 {offsets = [4, 0], sizes = [1, 256], strides = [1, 1]} : vector<8x256xf32> to vector<1x256xf32>
    %80 = vector.broadcast %73 : vector<8x1xf32> to vector<8x256xf32>
    %81 = vector.broadcast %79 : vector<1x256xf32> to vector<8x256xf32>
    %82 = arith.mulf %80, %81 : vector<8x256xf32>
    %83 = arith.addf %67, %82 : vector<8x256xf32>
    %c0_12 = arith.constant 0 : index
    %c5 = arith.constant 5 : index
    %84 = vector.load %arg2[%c0_12, %c5] : memref<8x128xf32, #tpu.memory_space<vmem>>, vector<8x1xf32>
    %85 = vector.extract_strided_slice %72 {offsets = [1, 0], sizes = [1, 256], strides = [1, 1]} : vector<8x256xf32> to vector<1x256xf32>
    %86 = vector.broadcast %84 : vector<8x1xf32> to vector<8x256xf32>
    %87 = vector.broadcast %85 : vector<1x256xf32> to vector<8x256xf32>
    %88 = arith.mulf %86, %87 : vector<8x256xf32>
    %89 = arith.addf %78, %88 : vector<8x256xf32>
    %90 = vector.extract_strided_slice %72 {offsets = [5, 0], sizes = [1, 256], strides = [1, 1]} : vector<8x256xf32> to vector<1x256xf32>
    %91 = vector.broadcast %84 : vector<8x1xf32> to vector<8x256xf32>
    %92 = vector.broadcast %90 : vector<1x256xf32> to vector<8x256xf32>
    %93 = arith.mulf %91, %92 : vector<8x256xf32>
    %94 = arith.addf %83, %93 : vector<8x256xf32>
    %c0_13 = arith.constant 0 : index
    %c6 = arith.constant 6 : index
    %95 = vector.load %arg2[%c0_13, %c6] : memref<8x128xf32, #tpu.memory_space<vmem>>, vector<8x1xf32>
    %96 = vector.extract_strided_slice %72 {offsets = [2, 0], sizes = [1, 256], strides = [1, 1]} : vector<8x256xf32> to vector<1x256xf32>
    %97 = vector.broadcast %95 : vector<8x1xf32> to vector<8x256xf32>
    %98 = vector.broadcast %96 : vector<1x256xf32> to vector<8x256xf32>
    %99 = arith.mulf %97, %98 : vector<8x256xf32>
    %100 = arith.addf %89, %99 : vector<8x256xf32>
    %101 = vector.extract_strided_slice %72 {offsets = [6, 0], sizes = [1, 256], strides = [1, 1]} : vector<8x256xf32> to vector<1x256xf32>
    %102 = vector.broadcast %95 : vector<8x1xf32> to vector<8x256xf32>
    %103 = vector.broadcast %101 : vector<1x256xf32> to vector<8x256xf32>
    %104 = arith.mulf %102, %103 : vector<8x256xf32>
    %105 = arith.addf %94, %104 : vector<8x256xf32>
    %c0_14 = arith.constant 0 : index
    %c7 = arith.constant 7 : index
    %106 = vector.load %arg2[%c0_14, %c7] : memref<8x128xf32, #tpu.memory_space<vmem>>, vector<8x1xf32>
    %107 = vector.extract_strided_slice %72 {offsets = [3, 0], sizes = [1, 256], strides = [1, 1]} : vector<8x256xf32> to vector<1x256xf32>
    %108 = vector.broadcast %106 : vector<8x1xf32> to vector<8x256xf32>
    %109 = vector.broadcast %107 : vector<1x256xf32> to vector<8x256xf32>
    %110 = arith.mulf %108, %109 : vector<8x256xf32>
    %111 = arith.addf %100, %110 : vector<8x256xf32>
    %112 = vector.extract_strided_slice %72 {offsets = [7, 0], sizes = [1, 256], strides = [1, 1]} : vector<8x256xf32> to vector<1x256xf32>
    %113 = vector.broadcast %106 : vector<8x1xf32> to vector<8x256xf32>
    %114 = vector.broadcast %112 : vector<1x256xf32> to vector<8x256xf32>
    %115 = arith.mulf %113, %114 : vector<8x256xf32>
    %116 = arith.addf %105, %115 : vector<8x256xf32>
    %c15_i32_15 = arith.constant 15 : i32
    %117 = tpu.dynamic_rotate %11 by %c15_i32_15 dim 1 : vector<8x256xf32>, i32 -> vector<8x256xf32>
    %118 = arith.andi %8, %6 : vector<1x256xi1>
    %cst_16 = arith.constant 0.000000e+00 : f32
    %119 = vector.shape_cast %118 : vector<1x256xi1> to vector<1x256xi1>
    %120 = vector.broadcast %119 : vector<1x256xi1> to vector<8x256xi1>
    %121 = vector.broadcast %cst_16 : f32 to vector<8x256xf32>
    %122 = arith.select %120, %117, %121 : vector<8x256xi1>, vector<8x256xf32>
    %c0_17 = arith.constant 0 : index
    %c8 = arith.constant 8 : index
    %123 = vector.load %arg2[%c0_17, %c8] : memref<8x128xf32, #tpu.memory_space<vmem>>, vector<8x1xf32>
    %124 = vector.extract_strided_slice %122 {offsets = [0, 0], sizes = [1, 256], strides = [1, 1]} : vector<8x256xf32> to vector<1x256xf32>
    %125 = vector.broadcast %123 : vector<8x1xf32> to vector<8x256xf32>
    %126 = vector.broadcast %124 : vector<1x256xf32> to vector<8x256xf32>
    %127 = arith.mulf %125, %126 : vector<8x256xf32>
    %128 = arith.addf %111, %127 : vector<8x256xf32>
    %129 = vector.extract_strided_slice %122 {offsets = [4, 0], sizes = [1, 256], strides = [1, 1]} : vector<8x256xf32> to vector<1x256xf32>
    %130 = vector.broadcast %123 : vector<8x1xf32> to vector<8x256xf32>
    %131 = vector.broadcast %129 : vector<1x256xf32> to vector<8x256xf32>
    %132 = arith.mulf %130, %131 : vector<8x256xf32>
    %133 = arith.addf %116, %132 : vector<8x256xf32>
    %c0_18 = arith.constant 0 : index
    %c9 = arith.constant 9 : index
    %134 = vector.load %arg2[%c0_18, %c9] : memref<8x128xf32, #tpu.memory_space<vmem>>, vector<8x1xf32>
    %135 = vector.extract_strided_slice %122 {offsets = [1, 0], sizes = [1, 256], strides = [1, 1]} : vector<8x256xf32> to vector<1x256xf32>
    %136 = vector.broadcast %134 : vector<8x1xf32> to vector<8x256xf32>
    %137 = vector.broadcast %135 : vector<1x256xf32> to vector<8x256xf32>
    %138 = arith.mulf %136, %137 : vector<8x256xf32>
    %139 = arith.addf %128, %138 : vector<8x256xf32>
    %140 = vector.extract_strided_slice %122 {offsets = [5, 0], sizes = [1, 256], strides = [1, 1]} : vector<8x256xf32> to vector<1x256xf32>
    %141 = vector.broadcast %134 : vector<8x1xf32> to vector<8x256xf32>
    %142 = vector.broadcast %140 : vector<1x256xf32> to vector<8x256xf32>
    %143 = arith.mulf %141, %142 : vector<8x256xf32>
    %144 = arith.addf %133, %143 : vector<8x256xf32>
    %c0_19 = arith.constant 0 : index
    %c10 = arith.constant 10 : index
    %145 = vector.load %arg2[%c0_19, %c10] : memref<8x128xf32, #tpu.memory_space<vmem>>, vector<8x1xf32>
    %146 = vector.extract_strided_slice %122 {offsets = [2, 0], sizes = [1, 256], strides = [1, 1]} : vector<8x256xf32> to vector<1x256xf32>
    %147 = vector.broadcast %145 : vector<8x1xf32> to vector<8x256xf32>
    %148 = vector.broadcast %146 : vector<1x256xf32> to vector<8x256xf32>
    %149 = arith.mulf %147, %148 : vector<8x256xf32>
    %150 = arith.addf %139, %149 : vector<8x256xf32>
    %151 = vector.extract_strided_slice %122 {offsets = [6, 0], sizes = [1, 256], strides = [1, 1]} : vector<8x256xf32> to vector<1x256xf32>
    %152 = vector.broadcast %145 : vector<8x1xf32> to vector<8x256xf32>
    %153 = vector.broadcast %151 : vector<1x256xf32> to vector<8x256xf32>
    %154 = arith.mulf %152, %153 : vector<8x256xf32>
    %155 = arith.addf %144, %154 : vector<8x256xf32>
    %c0_20 = arith.constant 0 : index
    %c11 = arith.constant 11 : index
    %156 = vector.load %arg2[%c0_20, %c11] : memref<8x128xf32, #tpu.memory_space<vmem>>, vector<8x1xf32>
    %157 = vector.extract_strided_slice %122 {offsets = [3, 0], sizes = [1, 256], strides = [1, 1]} : vector<8x256xf32> to vector<1x256xf32>
    %158 = vector.broadcast %156 : vector<8x1xf32> to vector<8x256xf32>
    %159 = vector.broadcast %157 : vector<1x256xf32> to vector<8x256xf32>
    %160 = arith.mulf %158, %159 : vector<8x256xf32>
    %161 = arith.addf %150, %160 : vector<8x256xf32>
    %162 = vector.extract_strided_slice %122 {offsets = [7, 0], sizes = [1, 256], strides = [1, 1]} : vector<8x256xf32> to vector<1x256xf32>
    %163 = vector.broadcast %156 : vector<8x1xf32> to vector<8x256xf32>
    %164 = vector.broadcast %162 : vector<1x256xf32> to vector<8x256xf32>
    %165 = arith.mulf %163, %164 : vector<8x256xf32>
    %166 = arith.addf %155, %165 : vector<8x256xf32>
    %c1_i32 = arith.constant 1 : i32
    %167 = tpu.dynamic_rotate %11 by %c1_i32 dim 1 : vector<8x256xf32>, i32 -> vector<8x256xf32>
    %cst_21 = arith.constant 0.000000e+00 : f32
    %168 = vector.shape_cast %4 : vector<1x256xi1> to vector<1x256xi1>
    %169 = vector.broadcast %168 : vector<1x256xi1> to vector<8x256xi1>
    %170 = vector.broadcast %cst_21 : f32 to vector<8x256xf32>
    %171 = arith.select %169, %167, %170 : vector<8x256xi1>, vector<8x256xf32>
    %c0_22 = arith.constant 0 : index
    %c12 = arith.constant 12 : index
    %172 = vector.load %arg2[%c0_22, %c12] : memref<8x128xf32, #tpu.memory_space<vmem>>, vector<8x1xf32>
    %173 = vector.extract_strided_slice %171 {offsets = [0, 0], sizes = [1, 256], strides = [1, 1]} : vector<8x256xf32> to vector<1x256xf32>
    %174 = vector.broadcast %172 : vector<8x1xf32> to vector<8x256xf32>
    %175 = vector.broadcast %173 : vector<1x256xf32> to vector<8x256xf32>
    %176 = arith.mulf %174, %175 : vector<8x256xf32>
    %177 = arith.addf %161, %176 : vector<8x256xf32>
    %178 = vector.extract_strided_slice %171 {offsets = [4, 0], sizes = [1, 256], strides = [1, 1]} : vector<8x256xf32> to vector<1x256xf32>
    %179 = vector.broadcast %172 : vector<8x1xf32> to vector<8x256xf32>
    %180 = vector.broadcast %178 : vector<1x256xf32> to vector<8x256xf32>
    %181 = arith.mulf %179, %180 : vector<8x256xf32>
    %182 = arith.addf %166, %181 : vector<8x256xf32>
    %c0_23 = arith.constant 0 : index
    %c13 = arith.constant 13 : index
    %183 = vector.load %arg2[%c0_23, %c13] : memref<8x128xf32, #tpu.memory_space<vmem>>, vector<8x1xf32>
    %184 = vector.extract_strided_slice %171 {offsets = [1, 0], sizes = [1, 256], strides = [1, 1]} : vector<8x256xf32> to vector<1x256xf32>
    %185 = vector.broadcast %183 : vector<8x1xf32> to vector<8x256xf32>
    %186 = vector.broadcast %184 : vector<1x256xf32> to vector<8x256xf32>
    %187 = arith.mulf %185, %186 : vector<8x256xf32>
    %188 = arith.addf %177, %187 : vector<8x256xf32>
    %189 = vector.extract_strided_slice %171 {offsets = [5, 0], sizes = [1, 256], strides = [1, 1]} : vector<8x256xf32> to vector<1x256xf32>
    %190 = vector.broadcast %183 : vector<8x1xf32> to vector<8x256xf32>
    %191 = vector.broadcast %189 : vector<1x256xf32> to vector<8x256xf32>
    %192 = arith.mulf %190, %191 : vector<8x256xf32>
    %193 = arith.addf %182, %192 : vector<8x256xf32>
    %c0_24 = arith.constant 0 : index
    %c14 = arith.constant 14 : index
    %194 = vector.load %arg2[%c0_24, %c14] : memref<8x128xf32, #tpu.memory_space<vmem>>, vector<8x1xf32>
    %195 = vector.extract_strided_slice %171 {offsets = [2, 0], sizes = [1, 256], strides = [1, 1]} : vector<8x256xf32> to vector<1x256xf32>
    %196 = vector.broadcast %194 : vector<8x1xf32> to vector<8x256xf32>
    %197 = vector.broadcast %195 : vector<1x256xf32> to vector<8x256xf32>
    %198 = arith.mulf %196, %197 : vector<8x256xf32>
    %199 = arith.addf %188, %198 : vector<8x256xf32>
    %200 = vector.extract_strided_slice %171 {offsets = [6, 0], sizes = [1, 256], strides = [1, 1]} : vector<8x256xf32> to vector<1x256xf32>
    %201 = vector.broadcast %194 : vector<8x1xf32> to vector<8x256xf32>
    %202 = vector.broadcast %200 : vector<1x256xf32> to vector<8x256xf32>
    %203 = arith.mulf %201, %202 : vector<8x256xf32>
    %204 = arith.addf %193, %203 : vector<8x256xf32>
    %c0_25 = arith.constant 0 : index
    %c15 = arith.constant 15 : index
    %205 = vector.load %arg2[%c0_25, %c15] : memref<8x128xf32, #tpu.memory_space<vmem>>, vector<8x1xf32>
    %206 = vector.extract_strided_slice %171 {offsets = [3, 0], sizes = [1, 256], strides = [1, 1]} : vector<8x256xf32> to vector<1x256xf32>
    %207 = vector.broadcast %205 : vector<8x1xf32> to vector<8x256xf32>
    %208 = vector.broadcast %206 : vector<1x256xf32> to vector<8x256xf32>
    %209 = arith.mulf %207, %208 : vector<8x256xf32>
    %210 = arith.addf %199, %209 : vector<8x256xf32>
    %211 = vector.extract_strided_slice %171 {offsets = [7, 0], sizes = [1, 256], strides = [1, 1]} : vector<8x256xf32> to vector<1x256xf32>
    %212 = vector.broadcast %205 : vector<8x1xf32> to vector<8x256xf32>
    %213 = vector.broadcast %211 : vector<1x256xf32> to vector<8x256xf32>
    %214 = arith.mulf %212, %213 : vector<8x256xf32>
    %215 = arith.addf %204, %214 : vector<8x256xf32>
    %c0_26 = arith.constant 0 : index
    %c16 = arith.constant 16 : index
    %216 = vector.load %arg2[%c0_26, %c16] : memref<8x128xf32, #tpu.memory_space<vmem>>, vector<8x1xf32>
    %217 = vector.extract_strided_slice %11 {offsets = [0, 0], sizes = [1, 256], strides = [1, 1]} : vector<8x256xf32> to vector<1x256xf32>
    %218 = vector.broadcast %216 : vector<8x1xf32> to vector<8x256xf32>
    %219 = vector.broadcast %217 : vector<1x256xf32> to vector<8x256xf32>
    %220 = arith.mulf %218, %219 : vector<8x256xf32>
    %221 = arith.addf %210, %220 : vector<8x256xf32>
    %222 = vector.extract_strided_slice %11 {offsets = [4, 0], sizes = [1, 256], strides = [1, 1]} : vector<8x256xf32> to vector<1x256xf32>
    %223 = vector.broadcast %216 : vector<8x1xf32> to vector<8x256xf32>
    %224 = vector.broadcast %222 : vector<1x256xf32> to vector<8x256xf32>
    %225 = arith.mulf %223, %224 : vector<8x256xf32>
    %226 = arith.addf %215, %225 : vector<8x256xf32>
    %c0_27 = arith.constant 0 : index
    %c17 = arith.constant 17 : index
    %227 = vector.load %arg2[%c0_27, %c17] : memref<8x128xf32, #tpu.memory_space<vmem>>, vector<8x1xf32>
    %228 = vector.extract_strided_slice %11 {offsets = [1, 0], sizes = [1, 256], strides = [1, 1]} : vector<8x256xf32> to vector<1x256xf32>
    %229 = vector.broadcast %227 : vector<8x1xf32> to vector<8x256xf32>
    %230 = vector.broadcast %228 : vector<1x256xf32> to vector<8x256xf32>
    %231 = arith.mulf %229, %230 : vector<8x256xf32>
    %232 = arith.addf %221, %231 : vector<8x256xf32>
    %233 = vector.extract_strided_slice %11 {offsets = [5, 0], sizes = [1, 256], strides = [1, 1]} : vector<8x256xf32> to vector<1x256xf32>
    %234 = vector.broadcast %227 : vector<8x1xf32> to vector<8x256xf32>
    %235 = vector.broadcast %233 : vector<1x256xf32> to vector<8x256xf32>
    %236 = arith.mulf %234, %235 : vector<8x256xf32>
    %237 = arith.addf %226, %236 : vector<8x256xf32>
    %c0_28 = arith.constant 0 : index
    %c18 = arith.constant 18 : index
    %238 = vector.load %arg2[%c0_28, %c18] : memref<8x128xf32, #tpu.memory_space<vmem>>, vector<8x1xf32>
    %239 = vector.extract_strided_slice %11 {offsets = [2, 0], sizes = [1, 256], strides = [1, 1]} : vector<8x256xf32> to vector<1x256xf32>
    %240 = vector.broadcast %238 : vector<8x1xf32> to vector<8x256xf32>
    %241 = vector.broadcast %239 : vector<1x256xf32> to vector<8x256xf32>
    %242 = arith.mulf %240, %241 : vector<8x256xf32>
    %243 = arith.addf %232, %242 : vector<8x256xf32>
    %244 = vector.extract_strided_slice %11 {offsets = [6, 0], sizes = [1, 256], strides = [1, 1]} : vector<8x256xf32> to vector<1x256xf32>
    %245 = vector.broadcast %238 : vector<8x1xf32> to vector<8x256xf32>
    %246 = vector.broadcast %244 : vector<1x256xf32> to vector<8x256xf32>
    %247 = arith.mulf %245, %246 : vector<8x256xf32>
    %248 = arith.addf %237, %247 : vector<8x256xf32>
    %c0_29 = arith.constant 0 : index
    %c19 = arith.constant 19 : index
    %249 = vector.load %arg2[%c0_29, %c19] : memref<8x128xf32, #tpu.memory_space<vmem>>, vector<8x1xf32>
    %250 = vector.extract_strided_slice %11 {offsets = [3, 0], sizes = [1, 256], strides = [1, 1]} : vector<8x256xf32> to vector<1x256xf32>
    %251 = vector.broadcast %249 : vector<8x1xf32> to vector<8x256xf32>
    %252 = vector.broadcast %250 : vector<1x256xf32> to vector<8x256xf32>
    %253 = arith.mulf %251, %252 : vector<8x256xf32>
    %254 = arith.addf %243, %253 : vector<8x256xf32>
    %255 = vector.extract_strided_slice %11 {offsets = [7, 0], sizes = [1, 256], strides = [1, 1]} : vector<8x256xf32> to vector<1x256xf32>
    %256 = vector.broadcast %249 : vector<8x1xf32> to vector<8x256xf32>
    %257 = vector.broadcast %255 : vector<1x256xf32> to vector<8x256xf32>
    %258 = arith.mulf %256, %257 : vector<8x256xf32>
    %259 = arith.addf %248, %258 : vector<8x256xf32>
    %c255_i32 = arith.constant 255 : i32
    %260 = tpu.dynamic_rotate %11 by %c255_i32 dim 1 : vector<8x256xf32>, i32 -> vector<8x256xf32>
    %cst_30 = arith.constant 0.000000e+00 : f32
    %261 = vector.shape_cast %6 : vector<1x256xi1> to vector<1x256xi1>
    %262 = vector.broadcast %261 : vector<1x256xi1> to vector<8x256xi1>
    %263 = vector.broadcast %cst_30 : f32 to vector<8x256xf32>
    %264 = arith.select %262, %260, %263 : vector<8x256xi1>, vector<8x256xf32>
    %c0_31 = arith.constant 0 : index
    %c20 = arith.constant 20 : index
    %265 = vector.load %arg2[%c0_31, %c20] : memref<8x128xf32, #tpu.memory_space<vmem>>, vector<8x1xf32>
    %266 = vector.extract_strided_slice %264 {offsets = [0, 0], sizes = [1, 256], strides = [1, 1]} : vector<8x256xf32> to vector<1x256xf32>
    %267 = vector.broadcast %265 : vector<8x1xf32> to vector<8x256xf32>
    %268 = vector.broadcast %266 : vector<1x256xf32> to vector<8x256xf32>
    %269 = arith.mulf %267, %268 : vector<8x256xf32>
    %270 = arith.addf %254, %269 : vector<8x256xf32>
    %271 = vector.extract_strided_slice %264 {offsets = [4, 0], sizes = [1, 256], strides = [1, 1]} : vector<8x256xf32> to vector<1x256xf32>
    %272 = vector.broadcast %265 : vector<8x1xf32> to vector<8x256xf32>
    %273 = vector.broadcast %271 : vector<1x256xf32> to vector<8x256xf32>
    %274 = arith.mulf %272, %273 : vector<8x256xf32>
    %275 = arith.addf %259, %274 : vector<8x256xf32>
    %c0_32 = arith.constant 0 : index
    %c21 = arith.constant 21 : index
    %276 = vector.load %arg2[%c0_32, %c21] : memref<8x128xf32, #tpu.memory_space<vmem>>, vector<8x1xf32>
    %277 = vector.extract_strided_slice %264 {offsets = [1, 0], sizes = [1, 256], strides = [1, 1]} : vector<8x256xf32> to vector<1x256xf32>
    %278 = vector.broadcast %276 : vector<8x1xf32> to vector<8x256xf32>
    %279 = vector.broadcast %277 : vector<1x256xf32> to vector<8x256xf32>
    %280 = arith.mulf %278, %279 : vector<8x256xf32>
    %281 = arith.addf %270, %280 : vector<8x256xf32>
    %282 = vector.extract_strided_slice %264 {offsets = [5, 0], sizes = [1, 256], strides = [1, 1]} : vector<8x256xf32> to vector<1x256xf32>
    %283 = vector.broadcast %276 : vector<8x1xf32> to vector<8x256xf32>
    %284 = vector.broadcast %282 : vector<1x256xf32> to vector<8x256xf32>
    %285 = arith.mulf %283, %284 : vector<8x256xf32>
    %286 = arith.addf %275, %285 : vector<8x256xf32>
    %c0_33 = arith.constant 0 : index
    %c22 = arith.constant 22 : index
    %287 = vector.load %arg2[%c0_33, %c22] : memref<8x128xf32, #tpu.memory_space<vmem>>, vector<8x1xf32>
    %288 = vector.extract_strided_slice %264 {offsets = [2, 0], sizes = [1, 256], strides = [1, 1]} : vector<8x256xf32> to vector<1x256xf32>
    %289 = vector.broadcast %287 : vector<8x1xf32> to vector<8x256xf32>
    %290 = vector.broadcast %288 : vector<1x256xf32> to vector<8x256xf32>
    %291 = arith.mulf %289, %290 : vector<8x256xf32>
    %292 = arith.addf %281, %291 : vector<8x256xf32>
    %293 = vector.extract_strided_slice %264 {offsets = [6, 0], sizes = [1, 256], strides = [1, 1]} : vector<8x256xf32> to vector<1x256xf32>
    %294 = vector.broadcast %287 : vector<8x1xf32> to vector<8x256xf32>
    %295 = vector.broadcast %293 : vector<1x256xf32> to vector<8x256xf32>
    %296 = arith.mulf %294, %295 : vector<8x256xf32>
    %297 = arith.addf %286, %296 : vector<8x256xf32>
    %c0_34 = arith.constant 0 : index
    %c23 = arith.constant 23 : index
    %298 = vector.load %arg2[%c0_34, %c23] : memref<8x128xf32, #tpu.memory_space<vmem>>, vector<8x1xf32>
    %299 = vector.extract_strided_slice %264 {offsets = [3, 0], sizes = [1, 256], strides = [1, 1]} : vector<8x256xf32> to vector<1x256xf32>
    %300 = vector.broadcast %298 : vector<8x1xf32> to vector<8x256xf32>
    %301 = vector.broadcast %299 : vector<1x256xf32> to vector<8x256xf32>
    %302 = arith.mulf %300, %301 : vector<8x256xf32>
    %303 = arith.addf %292, %302 : vector<8x256xf32>
    %304 = vector.extract_strided_slice %264 {offsets = [7, 0], sizes = [1, 256], strides = [1, 1]} : vector<8x256xf32> to vector<1x256xf32>
    %305 = vector.broadcast %298 : vector<8x1xf32> to vector<8x256xf32>
    %306 = vector.broadcast %304 : vector<1x256xf32> to vector<8x256xf32>
    %307 = arith.mulf %305, %306 : vector<8x256xf32>
    %308 = arith.addf %297, %307 : vector<8x256xf32>
    %c241_i32 = arith.constant 241 : i32
    %309 = tpu.dynamic_rotate %11 by %c241_i32 dim 1 : vector<8x256xf32>, i32 -> vector<8x256xf32>
    %310 = arith.andi %10, %4 : vector<1x256xi1>
    %cst_35 = arith.constant 0.000000e+00 : f32
    %311 = vector.shape_cast %310 : vector<1x256xi1> to vector<1x256xi1>
    %312 = vector.broadcast %311 : vector<1x256xi1> to vector<8x256xi1>
    %313 = vector.broadcast %cst_35 : f32 to vector<8x256xf32>
    %314 = arith.select %312, %309, %313 : vector<8x256xi1>, vector<8x256xf32>
    %c0_36 = arith.constant 0 : index
    %c24 = arith.constant 24 : index
    %315 = vector.load %arg2[%c0_36, %c24] : memref<8x128xf32, #tpu.memory_space<vmem>>, vector<8x1xf32>
    %316 = vector.extract_strided_slice %314 {offsets = [0, 0], sizes = [1, 256], strides = [1, 1]} : vector<8x256xf32> to vector<1x256xf32>
    %317 = vector.broadcast %315 : vector<8x1xf32> to vector<8x256xf32>
    %318 = vector.broadcast %316 : vector<1x256xf32> to vector<8x256xf32>
    %319 = arith.mulf %317, %318 : vector<8x256xf32>
    %320 = arith.addf %303, %319 : vector<8x256xf32>
    %321 = vector.extract_strided_slice %314 {offsets = [4, 0], sizes = [1, 256], strides = [1, 1]} : vector<8x256xf32> to vector<1x256xf32>
    %322 = vector.broadcast %315 : vector<8x1xf32> to vector<8x256xf32>
    %323 = vector.broadcast %321 : vector<1x256xf32> to vector<8x256xf32>
    %324 = arith.mulf %322, %323 : vector<8x256xf32>
    %325 = arith.addf %308, %324 : vector<8x256xf32>
    %c0_37 = arith.constant 0 : index
    %c25 = arith.constant 25 : index
    %326 = vector.load %arg2[%c0_37, %c25] : memref<8x128xf32, #tpu.memory_space<vmem>>, vector<8x1xf32>
    %327 = vector.extract_strided_slice %314 {offsets = [1, 0], sizes = [1, 256], strides = [1, 1]} : vector<8x256xf32> to vector<1x256xf32>
    %328 = vector.broadcast %326 : vector<8x1xf32> to vector<8x256xf32>
    %329 = vector.broadcast %327 : vector<1x256xf32> to vector<8x256xf32>
    %330 = arith.mulf %328, %329 : vector<8x256xf32>
    %331 = arith.addf %320, %330 : vector<8x256xf32>
    %332 = vector.extract_strided_slice %314 {offsets = [5, 0], sizes = [1, 256], strides = [1, 1]} : vector<8x256xf32> to vector<1x256xf32>
    %333 = vector.broadcast %326 : vector<8x1xf32> to vector<8x256xf32>
    %334 = vector.broadcast %332 : vector<1x256xf32> to vector<8x256xf32>
    %335 = arith.mulf %333, %334 : vector<8x256xf32>
    %336 = arith.addf %325, %335 : vector<8x256xf32>
    %c0_38 = arith.constant 0 : index
    %c26 = arith.constant 26 : index
    %337 = vector.load %arg2[%c0_38, %c26] : memref<8x128xf32, #tpu.memory_space<vmem>>, vector<8x1xf32>
    %338 = vector.extract_strided_slice %314 {offsets = [2, 0], sizes = [1, 256], strides = [1, 1]} : vector<8x256xf32> to vector<1x256xf32>
    %339 = vector.broadcast %337 : vector<8x1xf32> to vector<8x256xf32>
    %340 = vector.broadcast %338 : vector<1x256xf32> to vector<8x256xf32>
    %341 = arith.mulf %339, %340 : vector<8x256xf32>
    %342 = arith.addf %331, %341 : vector<8x256xf32>
    %343 = vector.extract_strided_slice %314 {offsets = [6, 0], sizes = [1, 256], strides = [1, 1]} : vector<8x256xf32> to vector<1x256xf32>
    %344 = vector.broadcast %337 : vector<8x1xf32> to vector<8x256xf32>
    %345 = vector.broadcast %343 : vector<1x256xf32> to vector<8x256xf32>
    %346 = arith.mulf %344, %345 : vector<8x256xf32>
    %347 = arith.addf %336, %346 : vector<8x256xf32>
    %c0_39 = arith.constant 0 : index
    %c27 = arith.constant 27 : index
    %348 = vector.load %arg2[%c0_39, %c27] : memref<8x128xf32, #tpu.memory_space<vmem>>, vector<8x1xf32>
    %349 = vector.extract_strided_slice %314 {offsets = [3, 0], sizes = [1, 256], strides = [1, 1]} : vector<8x256xf32> to vector<1x256xf32>
    %350 = vector.broadcast %348 : vector<8x1xf32> to vector<8x256xf32>
    %351 = vector.broadcast %349 : vector<1x256xf32> to vector<8x256xf32>
    %352 = arith.mulf %350, %351 : vector<8x256xf32>
    %353 = arith.addf %342, %352 : vector<8x256xf32>
    %354 = vector.extract_strided_slice %314 {offsets = [7, 0], sizes = [1, 256], strides = [1, 1]} : vector<8x256xf32> to vector<1x256xf32>
    %355 = vector.broadcast %348 : vector<8x1xf32> to vector<8x256xf32>
    %356 = vector.broadcast %354 : vector<1x256xf32> to vector<8x256xf32>
    %357 = arith.mulf %355, %356 : vector<8x256xf32>
    %358 = arith.addf %347, %357 : vector<8x256xf32>
    %c240_i32_40 = arith.constant 240 : i32
    %359 = tpu.dynamic_rotate %11 by %c240_i32_40 dim 1 : vector<8x256xf32>, i32 -> vector<8x256xf32>
    %cst_41 = arith.constant 0.000000e+00 : f32
    %360 = vector.shape_cast %10 : vector<1x256xi1> to vector<1x256xi1>
    %361 = vector.broadcast %360 : vector<1x256xi1> to vector<8x256xi1>
    %362 = vector.broadcast %cst_41 : f32 to vector<8x256xf32>
    %363 = arith.select %361, %359, %362 : vector<8x256xi1>, vector<8x256xf32>
    %c0_42 = arith.constant 0 : index
    %c28 = arith.constant 28 : index
    %364 = vector.load %arg2[%c0_42, %c28] : memref<8x128xf32, #tpu.memory_space<vmem>>, vector<8x1xf32>
    %365 = vector.extract_strided_slice %363 {offsets = [0, 0], sizes = [1, 256], strides = [1, 1]} : vector<8x256xf32> to vector<1x256xf32>
    %366 = vector.broadcast %364 : vector<8x1xf32> to vector<8x256xf32>
    %367 = vector.broadcast %365 : vector<1x256xf32> to vector<8x256xf32>
    %368 = arith.mulf %366, %367 : vector<8x256xf32>
    %369 = arith.addf %353, %368 : vector<8x256xf32>
    %370 = vector.extract_strided_slice %363 {offsets = [4, 0], sizes = [1, 256], strides = [1, 1]} : vector<8x256xf32> to vector<1x256xf32>
    %371 = vector.broadcast %364 : vector<8x1xf32> to vector<8x256xf32>
    %372 = vector.broadcast %370 : vector<1x256xf32> to vector<8x256xf32>
    %373 = arith.mulf %371, %372 : vector<8x256xf32>
    %374 = arith.addf %358, %373 : vector<8x256xf32>
    %c0_43 = arith.constant 0 : index
    %c29 = arith.constant 29 : index
    %375 = vector.load %arg2[%c0_43, %c29] : memref<8x128xf32, #tpu.memory_space<vmem>>, vector<8x1xf32>
    %376 = vector.extract_strided_slice %363 {offsets = [1, 0], sizes = [1, 256], strides = [1, 1]} : vector<8x256xf32> to vector<1x256xf32>
    %377 = vector.broadcast %375 : vector<8x1xf32> to vector<8x256xf32>
    %378 = vector.broadcast %376 : vector<1x256xf32> to vector<8x256xf32>
    %379 = arith.mulf %377, %378 : vector<8x256xf32>
    %380 = arith.addf %369, %379 : vector<8x256xf32>
    %381 = vector.extract_strided_slice %363 {offsets = [5, 0], sizes = [1, 256], strides = [1, 1]} : vector<8x256xf32> to vector<1x256xf32>
    %382 = vector.broadcast %375 : vector<8x1xf32> to vector<8x256xf32>
    %383 = vector.broadcast %381 : vector<1x256xf32> to vector<8x256xf32>
    %384 = arith.mulf %382, %383 : vector<8x256xf32>
    %385 = arith.addf %374, %384 : vector<8x256xf32>
    %c0_44 = arith.constant 0 : index
    %c30 = arith.constant 30 : index
    %386 = vector.load %arg2[%c0_44, %c30] : memref<8x128xf32, #tpu.memory_space<vmem>>, vector<8x1xf32>
    %387 = vector.extract_strided_slice %363 {offsets = [2, 0], sizes = [1, 256], strides = [1, 1]} : vector<8x256xf32> to vector<1x256xf32>
    %388 = vector.broadcast %386 : vector<8x1xf32> to vector<8x256xf32>
    %389 = vector.broadcast %387 : vector<1x256xf32> to vector<8x256xf32>
    %390 = arith.mulf %388, %389 : vector<8x256xf32>
    %391 = arith.addf %380, %390 : vector<8x256xf32>
    %392 = vector.extract_strided_slice %363 {offsets = [6, 0], sizes = [1, 256], strides = [1, 1]} : vector<8x256xf32> to vector<1x256xf32>
    %393 = vector.broadcast %386 : vector<8x1xf32> to vector<8x256xf32>
    %394 = vector.broadcast %392 : vector<1x256xf32> to vector<8x256xf32>
    %395 = arith.mulf %393, %394 : vector<8x256xf32>
    %396 = arith.addf %385, %395 : vector<8x256xf32>
    %c0_45 = arith.constant 0 : index
    %c31 = arith.constant 31 : index
    %397 = vector.load %arg2[%c0_45, %c31] : memref<8x128xf32, #tpu.memory_space<vmem>>, vector<8x1xf32>
    %398 = vector.extract_strided_slice %363 {offsets = [3, 0], sizes = [1, 256], strides = [1, 1]} : vector<8x256xf32> to vector<1x256xf32>
    %399 = vector.broadcast %397 : vector<8x1xf32> to vector<8x256xf32>
    %400 = vector.broadcast %398 : vector<1x256xf32> to vector<8x256xf32>
    %401 = arith.mulf %399, %400 : vector<8x256xf32>
    %402 = arith.addf %391, %401 : vector<8x256xf32>
    %403 = vector.extract_strided_slice %363 {offsets = [7, 0], sizes = [1, 256], strides = [1, 1]} : vector<8x256xf32> to vector<1x256xf32>
    %404 = vector.broadcast %397 : vector<8x1xf32> to vector<8x256xf32>
    %405 = vector.broadcast %403 : vector<1x256xf32> to vector<8x256xf32>
    %406 = arith.mulf %404, %405 : vector<8x256xf32>
    %407 = arith.addf %396, %406 : vector<8x256xf32>
    %c239_i32 = arith.constant 239 : i32
    %408 = tpu.dynamic_rotate %11 by %c239_i32 dim 1 : vector<8x256xf32>, i32 -> vector<8x256xf32>
    %409 = arith.andi %10, %6 : vector<1x256xi1>
    %cst_46 = arith.constant 0.000000e+00 : f32
    %410 = vector.shape_cast %409 : vector<1x256xi1> to vector<1x256xi1>
    %411 = vector.broadcast %410 : vector<1x256xi1> to vector<8x256xi1>
    %412 = vector.broadcast %cst_46 : f32 to vector<8x256xf32>
    %413 = arith.select %411, %408, %412 : vector<8x256xi1>, vector<8x256xf32>
    %c0_47 = arith.constant 0 : index
    %c32 = arith.constant 32 : index
    %414 = vector.load %arg2[%c0_47, %c32] : memref<8x128xf32, #tpu.memory_space<vmem>>, vector<8x1xf32>
    %415 = vector.extract_strided_slice %413 {offsets = [0, 0], sizes = [1, 256], strides = [1, 1]} : vector<8x256xf32> to vector<1x256xf32>
    %416 = vector.broadcast %414 : vector<8x1xf32> to vector<8x256xf32>
    %417 = vector.broadcast %415 : vector<1x256xf32> to vector<8x256xf32>
    %418 = arith.mulf %416, %417 : vector<8x256xf32>
    %419 = arith.addf %402, %418 : vector<8x256xf32>
    %420 = vector.extract_strided_slice %413 {offsets = [4, 0], sizes = [1, 256], strides = [1, 1]} : vector<8x256xf32> to vector<1x256xf32>
    %421 = vector.broadcast %414 : vector<8x1xf32> to vector<8x256xf32>
    %422 = vector.broadcast %420 : vector<1x256xf32> to vector<8x256xf32>
    %423 = arith.mulf %421, %422 : vector<8x256xf32>
    %424 = arith.addf %407, %423 : vector<8x256xf32>
    %c0_48 = arith.constant 0 : index
    %c33 = arith.constant 33 : index
    %425 = vector.load %arg2[%c0_48, %c33] : memref<8x128xf32, #tpu.memory_space<vmem>>, vector<8x1xf32>
    %426 = vector.extract_strided_slice %413 {offsets = [1, 0], sizes = [1, 256], strides = [1, 1]} : vector<8x256xf32> to vector<1x256xf32>
    %427 = vector.broadcast %425 : vector<8x1xf32> to vector<8x256xf32>
    %428 = vector.broadcast %426 : vector<1x256xf32> to vector<8x256xf32>
    %429 = arith.mulf %427, %428 : vector<8x256xf32>
    %430 = arith.addf %419, %429 : vector<8x256xf32>
    %431 = vector.extract_strided_slice %413 {offsets = [5, 0], sizes = [1, 256], strides = [1, 1]} : vector<8x256xf32> to vector<1x256xf32>
    %432 = vector.broadcast %425 : vector<8x1xf32> to vector<8x256xf32>
    %433 = vector.broadcast %431 : vector<1x256xf32> to vector<8x256xf32>
    %434 = arith.mulf %432, %433 : vector<8x256xf32>
    %435 = arith.addf %424, %434 : vector<8x256xf32>
    %c0_49 = arith.constant 0 : index
    %c34 = arith.constant 34 : index
    %436 = vector.load %arg2[%c0_49, %c34] : memref<8x128xf32, #tpu.memory_space<vmem>>, vector<8x1xf32>
    %437 = vector.extract_strided_slice %413 {offsets = [2, 0], sizes = [1, 256], strides = [1, 1]} : vector<8x256xf32> to vector<1x256xf32>
    %438 = vector.broadcast %436 : vector<8x1xf32> to vector<8x256xf32>
    %439 = vector.broadcast %437 : vector<1x256xf32> to vector<8x256xf32>
    %440 = arith.mulf %438, %439 : vector<8x256xf32>
    %441 = arith.addf %430, %440 : vector<8x256xf32>
    %442 = vector.extract_strided_slice %413 {offsets = [6, 0], sizes = [1, 256], strides = [1, 1]} : vector<8x256xf32> to vector<1x256xf32>
    %443 = vector.broadcast %436 : vector<8x1xf32> to vector<8x256xf32>
    %444 = vector.broadcast %442 : vector<1x256xf32> to vector<8x256xf32>
    %445 = arith.mulf %443, %444 : vector<8x256xf32>
    %446 = arith.addf %435, %445 : vector<8x256xf32>
    %c0_50 = arith.constant 0 : index
    %c35 = arith.constant 35 : index
    %447 = vector.load %arg2[%c0_50, %c35] : memref<8x128xf32, #tpu.memory_space<vmem>>, vector<8x1xf32>
    %448 = vector.extract_strided_slice %413 {offsets = [3, 0], sizes = [1, 256], strides = [1, 1]} : vector<8x256xf32> to vector<1x256xf32>
    %449 = vector.broadcast %447 : vector<8x1xf32> to vector<8x256xf32>
    %450 = vector.broadcast %448 : vector<1x256xf32> to vector<8x256xf32>
    %451 = arith.mulf %449, %450 : vector<8x256xf32>
    %452 = arith.addf %441, %451 : vector<8x256xf32>
    %453 = vector.extract_strided_slice %413 {offsets = [7, 0], sizes = [1, 256], strides = [1, 1]} : vector<8x256xf32> to vector<1x256xf32>
    %454 = vector.broadcast %447 : vector<8x1xf32> to vector<8x256xf32>
    %455 = vector.broadcast %453 : vector<1x256xf32> to vector<8x256xf32>
    %456 = arith.mulf %454, %455 : vector<8x256xf32>
    %457 = arith.addf %446, %456 : vector<8x256xf32>
    %cst_51 = arith.constant 0.000000e+00 : f32
    %458 = vector.broadcast %cst_51 : f32 to vector<8x256xf32>
    %459 = arith.cmpf oge, %452, %458 : vector<8x256xf32>
    %460 = vector.broadcast %13 : vector<8x1xf32> to vector<8x256xf32>
    %461 = arith.mulf %460, %452 : vector<8x256xf32>
    %462 = arith.select %459, %452, %461 : vector<8x256xi1>, vector<8x256xf32>
    %c0_52 = arith.constant 0 : index
    %c0_53 = arith.constant 0 : index
    %463 = vector.load %arg3[%c0_52, %c0_53] : memref<16x256xf32, #tpu.memory_space<vmem>>, vector<8x256xf32>
    tpu.vector_store %arg3[%c0_52, %c0_53], %462 {strides = array<i32>} : memref<16x256xf32, #tpu.memory_space<vmem>>, vector<8x256xf32>,
    %cst_54 = arith.constant 0.000000e+00 : f32
    %464 = vector.broadcast %cst_54 : f32 to vector<8x256xf32>
    %465 = arith.cmpf oge, %457, %464 : vector<8x256xf32>
    %466 = vector.broadcast %13 : vector<8x1xf32> to vector<8x256xf32>
    %467 = arith.mulf %466, %457 : vector<8x256xf32>
    %468 = arith.select %465, %457, %467 : vector<8x256xi1>, vector<8x256xf32>
    %c8_55 = arith.constant 8 : index
    %c0_56 = arith.constant 0 : index
    %469 = vector.load %arg3[%c8_55, %c0_56] : memref<16x256xf32, #tpu.memory_space<vmem>>, vector<8x256xf32>
    tpu.vector_store %arg3[%c8_55, %c0_56], %468 {strides = array<i32>} : memref<16x256xf32, #tpu.memory_space<vmem>>, vector<8x256xf32>,
    return
  }
  func.func @transform_0(%arg0: i32) -> (i32, i32) {
    %c0_i32 = arith.constant 0 : i32
    %c0_i32_0 = arith.constant 0 : i32
    %c0_i32_1 = arith.constant 0 : i32
    return %c0_i32, %c0_i32_0 : i32, i32
  }
  func.func @transform_1(%arg0: i32) -> (i32, i32) {
    %c0_i32 = arith.constant 0 : i32
    %c0_i32_0 = arith.constant 0 : i32
    %c0_i32_1 = arith.constant 0 : i32
    return %c0_i32, %c0_i32_0 : i32, i32
  }
  func.func @transform_2(%arg0: i32) -> (i32, i32) {
    %c0_i32 = arith.constant 0 : i32
    %c0_i32_0 = arith.constant 0 : i32
    %c0_i32_1 = arith.constant 0 : i32
    return %c0_i32, %c0_i32_0 : i32, i32
  }
}

</mosaic_0001>

<bundles_post_ra>
// kernel: tpu_custom_call.1
= control target key start
LH: loop header
LB: loop body
LE: loop exit
PB: predicated region body
PF: predicated region fallthrough
CT: control target
= control target key end

     0   :  { %7 = vsyncpa [#allocation3], 0  ;;  %s1394_s0 = inlined_call_operand.hbm [shape: f32[8,256], index: 0, kind: input, shape index: {}]   ;;  %s1395_s1 = inlined_call_operand.hbm [shape: f32[8,128], index: 1, kind: input, shape index: {}]   ;;  %s1396_s2 = inlined_call_operand.hbm [shape: f32[16,256], index: 2, kind: output, shape index: {}]  }
   0x1   :  { %8 = vsyncpa [#allocation6], 0 }
   0x2   :  { %9 = vsyncpa [#allocation4], 0  ;;  %s15_s11 = sshll.u32 %s1394_s0, 4  ;;  %s956_s12 = smov [#allocation2]   ;;  %s16_s11 = int_to_ptr.hbm [resolvable:$true] %s15_s11 }
   0x3   :  { %s17_s13 = sshll.u32 %s956_s12, 4  ;;  %s26_s16 = sshll.u32 %s1395_s1, 4  ;;  %s18_s13 = int_to_ptr.vmem [resolvable:$true] %s17_s13  ;;  %s27_s16 = int_to_ptr.hbm [resolvable:$true] %s26_s16 }
   0x4   :  { %20 = dma.hbm_to_vmem [thread:$0]  %s16_s11, 256, %s18_s13, [#allocation3]  }
   0x5   :  { %s957_s17 = smov [#allocation5]  }
   0x6   :  { %s28_s18 = sshll.u32 %s957_s17, 4  ;;  %s29_s18 = int_to_ptr.vmem [resolvable:$true] %s28_s18 }
   0x7   :  { %31 = dma.hbm_to_vmem [thread:$0]  %s27_s16, 128, %s29_s18, [#allocation6]  }
   0x8   :  { %950 = dma.done.wait [#allocation3], 256  }
   0x9   :  { %951 = vsyncadd [#allocation3], 4294967040 }
   0xa   :  { %952 = dma.done.wait [#allocation6], 128  }
   0xb   :  { %953 = vsyncadd [#allocation6], 4294967168  ;;  %v958_v0 = vmov 36   ;;  %v959_v1 = vmov 0   ;;  %v960_v2 = vmov 1   ;;  %v1027_v3 = vld [vmem:[#allocation5] sm:$0xff]  ;;  %v40_v30 = vlaneseq }
   0xc   :  { %839 = vset.pattern.permute.xlu0 %v958_v0  ;;  %840 = vset.pattern.permute.xlu1 %v959_v1  ;;  %v1029_v4 = vld [vmem:[#allocation2 + $0x8] sm:$0xff]  ;;  %s961_s0 = smov 17   ;;  %v1034_v5 = vld [vmem:[#allocation2] sm:$0xff]  ;;  %v962_v6 = vmov 3   ;;  %v963_v7 = vmov 2   ;;  %s964_s1 = smov 16  }
   0xd   :  { %841 = vset.pattern.permute.xlu2 %v960_v2  ;;  %58 = vperm.xlu0 %839, %v1027_v3   ;;  %v965_v8 = vmov 4   ;;  %v966_v9 = vmov 5   ;;  %v967_v10 = vmov 6   ;;  %v968_v11 = vmov 7   ;;  %s970_s19 = smov 15   ;;  %s976_s20 = smov 1  }
   0xe   :  { %63 = vrot.lane.b32.xlu1 %v1029_v4, %s961_s0  ;;  %93 = vperm.xlu2 %841, %v1027_v3   ;;  %v969_v12 = vmov 9   ;;  %v971_v13 = vmov 8   ;;  %v972_v14 = vmov 10   ;;  %v973_v15 = vmov 12   ;;  %s980_s21 = smov 113   ;;  %s986_s22 = smov 127  }
   0xf   :  { %v974_v16 = vmov 11   ;;  %v975_v17 = vmov 17   ;;  %v977_v18 = vmov 13   ;;  %v978_v19 = vmov 14   ;;  %s995_s23 = smov 112   ;;  %s998_s24 = smov 111  }
  0x10   :  { %v979_v20 = vmov 20   ;;  %v981_v21 = vmov 15   ;;  %v982_v22 = vmov 16   ;;  %v983_v23 = vmov 18   ;;  %s775_s27 = sshll.u32 %s1396_s2, 4  ;;  %s1004_s28 = smov [#allocation7]   ;;  %s776_s27 = int_to_ptr.hbm [resolvable:$true] %s775_s27 }
  0x11   :  { %v984_v24 = vmov 19   ;;  %v985_v25 = vmov 26   ;;  %v987_v27 = vmov 21   ;;  %v988_v28 = vmov 22   ;;  %s773_s29 = sshll.u32 %s1004_s28, 4  ;;  %s1005_s30 = smov 256   ;;  %s774_s29 = int_to_ptr.vmem [resolvable:$true] %s773_s29 }
  0x12   :  { %v989_v31 = vmov 23   ;;  %v990_v33 = vmov 29   ;;  %v1081_v34 = vand.u32 127, %v40_v30  ;;  %v991_v35 = vmov 25  }
  0x13   :  { %v992_v40 = vmov 24   ;;  %v993_v44 = vmov 32   ;;  %v994_v52 = vmov 27   ;;  %v996_v62 = vmov 28  }
  0x14   :  { %v1085_v36 = vadd.s32 128, %v1081_v34  ;;  %v43_v39 = vand.u32 15, %v1081_v34  ;;  %vm49_vm1 = vcmp.ge.s32.totalorder %v1081_v34, 16  ;;  %vm65_vm2 = vcmp.lt.s32.totalorder %v1081_v34, 17 }
  0x15   :  { %61 = vrot.lane.b32.xlu0 %v1034_v5, %s961_s0  ;;  %vm144_vm5 = vcmp.lt.s32.totalorder %v1081_v34, 16  ;;  %vm221_vm7 = vcmp.lt.s32.totalorder %v1081_v34, 15  ;;  %vm300_vm10 = vcmp.lt.s32.totalorder %v1081_v34, 1  ;;  %vm441_vm11 = vcmp.lt.s32.totalorder %v1081_v34, 127 }
  0x16   :  { %77 = vperm.xlu1 %840, %v1027_v3   ;;  %843 = vset.pattern.permute.xlu0 %v962_v6  ;;  %v44_v42 = vand.u32 15, %v1085_v36  ;;  %vm1095_vm0 = vcmp.gt.s32.totalorder %v43_v39, 0  ;;  %vm1195_vm6 = vcmp.lt.s32.totalorder %v43_v39, 15  ;;  %vm52_vm12 = vcmp.lt.s32.totalorder %v1085_v36, 240 }
  0x17   :  { %842 = vset.pattern.permute.xlu2 %v963_v7  ;;  %vm68_vm4 = vmand %vm49_vm1, %vm1095_vm0  ;;  %vm518_vm13 = vcmp.lt.s32.totalorder %v1081_v34, 113  ;;  %vm597_vm15 = vcmp.lt.s32.totalorder %v1081_v34, 112 }
  0x18   :  { %109 = vperm.xlu2 %842, %v1027_v3   ;;  %vm1103_vm3 = vcmp.gt.s32.totalorder %v44_v42, 0  ;;  %vm1202_vm8 = vcmp.lt.s32.totalorder %v44_v42, 15  ;;  %vm224_vm9 = vmand %vm49_vm1, %vm1195_vm6  ;;  %v1001_v42 = vmov 34  }
  0x19   :  { %vm522_vm14 = vmand %vm52_vm12, %vm1103_vm3 }
  0x1d   :  { %125 = vperm.xlu0 %843, %v1027_v3  }
  0x1e   :  { %140 = vrot.lane.b32.xlu1 %v1034_v5, %s964_s1 }
  0x1f   :  { %844 = vset.pattern.permute.xlu1 %v965_v8 }
  0x20   :  { %142 = vrot.lane.b32.xlu2 %v1029_v4, %s964_s1 }
  0x21   :  { %845 = vset.pattern.permute.xlu2 %v966_v9 }
  0x25   :  { %846 = vset.pattern.permute.xlu0 %v967_v10 }
  0x26   :  { %154 = vperm.xlu1 %844, %v1027_v3   ;;  %186 = vperm.xlu0 %846, %v1027_v3  }
  0x28   :  { %170 = vperm.xlu2 %845, %v1027_v3  }
  0x2e   :  { %847 = vset.pattern.permute.xlu1 %v968_v11  ;;  %849 = vset.pattern.permute.xlu0 %v969_v12 }
  0x2f   :  { %202 = vperm.xlu1 %847, %v1027_v3   ;;  %249 = vperm.xlu0 %849, %v1027_v3  }
  0x30   :  { %217 = vrot.lane.b32.xlu2 %v1034_v5, %s970_s19 }
  0x31   :  { %848 = vset.pattern.permute.xlu2 %v971_v13 }
  0x37   :  { %219 = vrot.lane.b32.xlu1 %v1029_v4, %s970_s19  ;;  %852 = vset.pattern.permute.xlu0 %v973_v15 }
  0x38   :  { %850 = vset.pattern.permute.xlu1 %v972_v14  ;;  %233 = vperm.xlu2 %848, %v1027_v3  }
  0x39   :  { %310 = vperm.xlu0 %852, %v1027_v3  }
  0x3f   :  { %265 = vperm.xlu1 %850, %v1027_v3  }
  0x40   :  { %851 = vset.pattern.permute.xlu2 %v974_v16 }
  0x41   :  { %281 = vperm.xlu2 %851, %v1027_v3   ;;  %857 = vset.pattern.permute.xlu0 %v975_v17 }
  0x42   :  { %390 = vperm.xlu0 %857, %v1027_v3  }
  0x47   :  { %296 = vrot.lane.b32.xlu1 %v1034_v5, %s976_s20 }
  0x48   :  { %853 = vset.pattern.permute.xlu1 %v977_v18 }
  0x49   :  { %298 = vrot.lane.b32.xlu2 %v1029_v4, %s976_s20 }
  0x4a   :  { %854 = vset.pattern.permute.xlu2 %v978_v19  ;;  %860 = vset.pattern.permute.xlu0 %v979_v20 }
  0x4b   :  { %451 = vperm.xlu0 %860, %v1027_v3  }
  0x4f   :  { %326 = vperm.xlu1 %853, %v1027_v3  }
  0x51   :  { %342 = vperm.xlu2 %854, %v1027_v3  }
  0x53   :  { %516 = vrot.lane.b32.xlu0 %v1029_v4, %s980_s21 }
  0x54   :  { %866 = vset.pattern.permute.xlu0 %v985_v25 }
  0x57   :  { %855 = vset.pattern.permute.xlu1 %v981_v21 }
  0x58   :  { %358 = vperm.xlu1 %855, %v1027_v3  }
  0x59   :  { %856 = vset.pattern.permute.xlu2 %v982_v22 }
  0x5a   :  { %374 = vperm.xlu2 %856, %v1027_v3  }
  0x5b   :  { %562 = vperm.xlu0 %866, %v1027_v3  }
  0x60   :  { %858 = vset.pattern.permute.xlu1 %v983_v23 }
  0x61   :  { %406 = vperm.xlu1 %858, %v1027_v3  }
  0x62   :  { %859 = vset.pattern.permute.xlu2 %v984_v24 }
  0x63   :  { %422 = vperm.xlu2 %859, %v1027_v3   ;;  %869 = vset.pattern.permute.xlu0 %v990_v33 }
  0x64   :  { %623 = vperm.xlu0 %869, %v1027_v3  }
  0x68   :  { %v1069_v26 = vpop.permute.xlu2 %93 }
  0x69   :  { %437 = vrot.lane.b32.xlu1 %v1034_v5, %s986_s22 }
  0x6a   :  { %861 = vset.pattern.permute.xlu1 %v987_v27 }
  0x6b   :  { %439 = vrot.lane.b32.xlu2 %v1029_v4, %s986_s22 }
  0x6c   :  { %862 = vset.pattern.permute.xlu2 %v988_v28  ;;  %872 = vset.pattern.permute.xlu0 %v993_v44 }
  0x6d   :  { %686 = vperm.xlu0 %872, %v1027_v3  }
  0x71   :  { %467 = vperm.xlu1 %861, %v1027_v3  }
  0x72   :  { %v1073_v29 = vpop.permute.xlu2 %109 }
  0x73   :  { %483 = vperm.xlu2 %862, %v1027_v3  }
  0x79   :  { %863 = vset.pattern.permute.xlu1 %v989_v31 }
  0x7a   :  { %499 = vperm.xlu1 %863, %v1027_v3   ;;  %v1077_v32 = vpop.permute.xlu2 %142 }
  0x7b   :  { %514 = vrot.lane.b32.xlu2 %v1034_v5, %s980_s21 }
  0x7c   :  { %865 = vset.pattern.permute.xlu2 %v991_v35 }
  0x7f   :  { %v59_v37 = vpop.permute.xlu0 %58 }
  0x80   :  { %v64_v38 = vpop.permute.xlu1 %63 }
  0x82   :  { %864 = vset.pattern.permute.xlu1 %v992_v40  ;;  %v1088_v41 = vpop.permute.xlu2 %170 }
  0x83   :  { %530 = vperm.xlu1 %864, %v1027_v3   ;;  %546 = vperm.xlu2 %865, %v1027_v3  }
  0x87   :  { %v62_v47 = vpop.permute.xlu0 %61 }
  0x88   :  { %v78_v46 = vpop.permute.xlu1 %77  ;;  %v66_v48 = vsel %vm65_vm2, %v62_v47, %v64_v38  ;;  %v67_v49 = vsel %vm65_vm2, %v64_v38, %v62_v47 }
  0x89   :  { %v1112_v50 = vsel %vm68_vm4, %v67_v49, 0.0  ;;  %v1116_v51 = vsel %vm1103_vm3, %v66_v48, 0.0  ;;  %v997_v48 = vmov 30  }
  0x8a   :  { %v80_v53 = vperm.slane %v1112_v50, 0  ;;  %v81_v54 = vperm.slane %v1116_v51, 0  ;;  %v86_v55 = vperm.slane %v1112_v50, 4  ;;  %v87_v56 = vperm.slane %v1116_v51, 4  ;;  %v1130_v61 = vpop.permute.xlu2 %217 }
  0x8b   :  { %867 = vset.pattern.permute.xlu1 %v994_v52  ;;  %593 = vrot.lane.b32.xlu2 %v1034_v5, %s995_s23  ;;  %v96_v57 = vperm.slane %v1112_v50, 1  ;;  %v97_v58 = vperm.slane %v1116_v51, 1  ;;  %v102_v59 = vperm.slane %v1112_v50, 5  ;;  %v103_v60 = vperm.slane %v1116_v51, 5 }
  0x8c   :  { %578 = vperm.xlu1 %867, %v1027_v3   ;;  %868 = vset.pattern.permute.xlu2 %v996_v62  ;;  %v82_v63 = vmul.f32 %v80_v53, %v78_v46  ;;  %v83_v0 = vmul.f32 %v81_v54, %v78_v46  ;;  %v88_v1 = vmul.f32 %v86_v55, %v78_v46  ;;  %v112_v15 = vperm.slane %v1112_v50, 2 }
  0x8d   :  { %v89_v2 = vmul.f32 %v87_v56, %v78_v46  ;;  %v98_v6 = vmul.f32 %v96_v57, %v1069_v26  ;;  %v99_v7 = vmul.f32 %v97_v58, %v1069_v26  ;;  %v104_v8 = vmul.f32 %v102_v59, %v1069_v26 }
  0x8e   :  { %v105_v9 = vmul.f32 %v103_v60, %v1069_v26  ;;  %v84_v10 = vadd.f32 %v82_v63, %v59_v37  ;;  %v85_v11 = vadd.f32 %v83_v0, %v59_v37  ;;  %v90_v12 = vadd.f32 %v88_v1, %v59_v37 }
  0x8f   :  { %v91_v13 = vadd.f32 %v89_v2, %v59_v37  ;;  %v113_v16 = vperm.slane %v1116_v51, 2  ;;  %v118_v17 = vperm.slane %v1112_v50, 6  ;;  %v119_v18 = vperm.slane %v1116_v51, 6  ;;  %v126_v19 = vpop.permute.xlu0 %125 }
  0x90   :  { %v141_v14 = vpop.permute.xlu1 %140  ;;  %v100_v22 = vadd.f32 %v98_v6, %v84_v10  ;;  %v101_v23 = vadd.f32 %v99_v7, %v85_v11  ;;  %v106_v25 = vadd.f32 %v104_v8, %v90_v12  ;;  %v114_v27 = vmul.f32 %v112_v15, %v1073_v29 }
  0x91   :  { %v1143_v20 = vsel %vm144_vm5, %v141_v14, %v1077_v32  ;;  %v146_v21 = vsel %vm144_vm5, %v1077_v32, %v141_v14  ;;  %v107_v26 = vadd.f32 %v105_v9, %v91_v13  ;;  %v115_v28 = vmul.f32 %v113_v16, %v1073_v29 }
  0x92   :  { %v1150_v24 = vsel %vm49_vm1, %v146_v21, 0.0  ;;  %v120_v30 = vmul.f32 %v118_v17, %v1073_v29  ;;  %v121_v31 = vmul.f32 %v119_v18, %v1073_v29  ;;  %v128_v33 = vperm.slane %v1112_v50, 3  ;;  %v1164_v54 = vpop.permute.xlu2 %233  ;;  %vm678_vm1 = vmand %vm52_vm12, %vm1202_vm8 }
  0x93   :  { %607 = vperm.xlu2 %868, %v1027_v3   ;;  %v116_v32 = vadd.f32 %v114_v27, %v100_v22  ;;  %v129_v35 = vperm.slane %v1116_v51, 3  ;;  %v134_v37 = vperm.slane %v1112_v50, 7  ;;  %v135_v38 = vperm.slane %v1116_v51, 7 }
  0x94   :  { %595 = vrot.lane.b32.xlu1 %v1029_v4, %s995_s23  ;;  %v117_v40 = vadd.f32 %v115_v28, %v101_v23  ;;  %v122_v44 = vadd.f32 %v120_v30, %v106_v25  ;;  %v123_v46 = vadd.f32 %v121_v31, %v107_v26  ;;  %v130_v47 = vmul.f32 %v128_v33, %v126_v19 }
  0x95   :  { %870 = vset.pattern.permute.xlu1 %v997_v48  ;;  %v131_v29 = vmul.f32 %v129_v35, %v126_v19  ;;  %v136_v49 = vmul.f32 %v134_v37, %v126_v19  ;;  %v137_v52 = vmul.f32 %v135_v38, %v126_v19  ;;  %v173_v53 = vperm.slane %v1150_v24, 1 }
  0x96   :  { %v132_v55 = vadd.f32 %v130_v47, %v116_v32  ;;  %v174_v50 = vperm.slane %v1143_v20, 1  ;;  %v179_v51 = vperm.slane %v1150_v24, 5  ;;  %v180_v56 = vperm.slane %v1143_v20, 5 }
  0x97   :  { %v133_v57 = vadd.f32 %v131_v29, %v117_v40  ;;  %v138_v58 = vadd.f32 %v136_v49, %v122_v44  ;;  %v139_v59 = vadd.f32 %v137_v52, %v123_v46  ;;  %v175_v60 = vmul.f32 %v173_v53, %v1088_v41 }
  0x98   :  { %v155_v62 = vpop.permute.xlu1 %154  ;;  %v176_v63 = vmul.f32 %v174_v50, %v1088_v41  ;;  %v181_v0 = vmul.f32 %v179_v51, %v1088_v41  ;;  %v182_v1 = vmul.f32 %v180_v56, %v1088_v41  ;;  %v157_v2 = vperm.slane %v1150_v24, 0  ;;  %v187_v9 = vpop.permute.xlu0 %186 }
  0x99   :  { %v158_v6 = vperm.slane %v1143_v20, 0  ;;  %v163_v7 = vperm.slane %v1150_v24, 4  ;;  %v164_v8 = vperm.slane %v1143_v20, 4  ;;  %v189_v11 = vperm.slane %v1150_v24, 2 }
  0x9a   :  { %v159_v10 = vmul.f32 %v157_v2, %v155_v62  ;;  %v190_v12 = vperm.slane %v1143_v20, 2  ;;  %v195_v15 = vperm.slane %v1150_v24, 6  ;;  %v196_v17 = vperm.slane %v1143_v20, 6 }
  0x9b   :  { %670 = vrot.lane.b32.xlu2 %v1034_v5, %s998_s24  ;;  %v160_v13 = vmul.f32 %v158_v6, %v155_v62  ;;  %v165_v41 = vmul.f32 %v163_v7, %v155_v62  ;;  %v166_v14 = vmul.f32 %v164_v8, %v155_v62  ;;  %v191_v18 = vmul.f32 %v189_v11, %v187_v9  ;;  %v1187_v37 = vpop.permute.xlu2 %281 }
  0x9c   :  { %639 = vperm.xlu1 %870, %v1027_v3   ;;  %v161_v16 = vadd.f32 %v159_v10, %v132_v55  ;;  %v192_v19 = vmul.f32 %v190_v12, %v187_v9  ;;  %v197_v25 = vmul.f32 %v195_v15, %v187_v9  ;;  %v198_v27 = vmul.f32 %v196_v17, %v187_v9 }
  0x9d   :  { %v162_v21 = vadd.f32 %v160_v13, %v133_v57  ;;  %v167_v22 = vadd.f32 %v165_v41, %v138_v58  ;;  %v168_v23 = vadd.f32 %v166_v14, %v139_v59  ;;  %v205_v28 = vperm.slane %v1150_v24, 3 }
  0x9e   :  { %v177_v26 = vadd.f32 %v175_v60, %v161_v16  ;;  %v206_v30 = vperm.slane %v1143_v20, 3  ;;  %v211_v35 = vperm.slane %v1150_v24, 7  ;;  %v212_v40 = vperm.slane %v1143_v20, 7 }
  0x9f   :  { %v178_v31 = vadd.f32 %v176_v63, %v162_v21  ;;  %v183_v33 = vadd.f32 %v181_v0, %v167_v22  ;;  %v184_v32 = vadd.f32 %v182_v1, %v168_v23  ;;  %v999_v49 = vmov 31  }
  0xa0   :  { %v193_v38 = vadd.f32 %v191_v18, %v177_v26  ;;  %871 = vset.pattern.permute.xlu2 %v999_v49  ;;  %v1000_v57 = vmov 33  }
  0xa1   :  { %v203_v44 = vpop.permute.xlu1 %202  ;;  %v194_v46 = vadd.f32 %v192_v19, %v178_v31  ;;  %v199_v47 = vadd.f32 %v197_v25, %v183_v33  ;;  %v200_v48 = vadd.f32 %v198_v27, %v184_v32  ;;  %v250_v8 = vpop.permute.xlu0 %249 }
  0xa2   :  { %v207_v29 = vmul.f32 %v205_v28, %v203_v44  ;;  %v208_v52 = vmul.f32 %v206_v30, %v203_v44  ;;  %v213_v53 = vmul.f32 %v211_v35, %v203_v44  ;;  %v214_v55 = vmul.f32 %v212_v40, %v203_v44 }
  0xa3   :  { %655 = vperm.xlu2 %871, %v1027_v3   ;;  %v1212_v62 = vpop.permute.xlu2 %298 }
  0xa4   :  { %v209_v50 = vadd.f32 %v207_v29, %v193_v38  ;;  %672 = vrot.lane.b32.xlu1 %v1029_v4, %s998_s24  ;;  %v210_v24 = vadd.f32 %v208_v52, %v194_v46  ;;  %v215_v51 = vadd.f32 %v213_v53, %v199_v47  ;;  %v216_v56 = vadd.f32 %v214_v55, %v200_v48 }
  0xa5   :  { %873 = vset.pattern.permute.xlu1 %v1000_v57  ;;  %v1002_v46 = vmov 35  }
  0xa9   :  { %v220_v59 = vpop.permute.xlu1 %219 }
  0xaa   :  { %v222_v39 = vsel %vm221_vm7, %v1130_v61, %v220_v59  ;;  %v223_v60 = vsel %vm221_vm7, %v220_v59, %v1130_v61 }
  0xab   :  { %v230_v63 = vsel %vm224_vm9, %v223_v60, 0.0  ;;  %v231_v0 = vsel %vm1202_vm8, %v222_v39, 0.0  ;;  %874 = vset.pattern.permute.xlu2 %v1001_v42  ;;  %v1222_v47 = vpop.permute.xlu2 %342 }
  0xac   :  { %702 = vperm.xlu1 %873, %v1027_v3   ;;  %v236_v1 = vperm.slane %v230_v63, 0  ;;  %v237_v2 = vperm.slane %v231_v0, 0  ;;  %v242_v6 = vperm.slane %v230_v63, 4  ;;  %v243_v7 = vperm.slane %v231_v0, 4  ;;  %718 = vperm.xlu2 %874, %v1027_v3  }
  0xad   :  { %v252_v9 = vperm.slane %v230_v63, 1  ;;  %v253_v10 = vperm.slane %v231_v0, 1  ;;  %v258_v61 = vperm.slane %v230_v63, 5  ;;  %v259_v11 = vperm.slane %v231_v0, 5 }
  0xae   :  { %v238_v12 = vmul.f32 %v236_v1, %v1164_v54  ;;  %v239_v13 = vmul.f32 %v237_v2, %v1164_v54  ;;  %v244_v41 = vmul.f32 %v242_v6, %v1164_v54  ;;  %v245_v14 = vmul.f32 %v243_v7, %v1164_v54 }
  0xaf   :  { %v254_v15 = vmul.f32 %v252_v9, %v250_v8  ;;  %v255_v16 = vmul.f32 %v253_v10, %v250_v8  ;;  %v260_v17 = vmul.f32 %v258_v61, %v250_v8  ;;  %v261_v18 = vmul.f32 %v259_v11, %v250_v8 }
  0xb0   :  { %v240_v19 = vadd.f32 %v238_v12, %v209_v50  ;;  %v241_v21 = vadd.f32 %v239_v13, %v210_v24  ;;  %v246_v22 = vadd.f32 %v244_v41, %v215_v51  ;;  %v247_v23 = vadd.f32 %v245_v14, %v216_v56  ;;  %v311_v41 = vpop.permute.xlu0 %310 }
  0xb1   :  { %v268_v25 = vperm.slane %v230_v63, 2  ;;  %v269_v26 = vperm.slane %v231_v0, 2  ;;  %v274_v27 = vperm.slane %v230_v63, 6  ;;  %v275_v28 = vperm.slane %v231_v0, 6  ;;  %v266_v30 = vpop.permute.xlu1 %265 }
  0xb2   :  { %v256_v31 = vadd.f32 %v254_v15, %v240_v19  ;;  %v257_v33 = vadd.f32 %v255_v16, %v241_v21  ;;  %v262_v32 = vadd.f32 %v260_v17, %v246_v22  ;;  %v263_v35 = vadd.f32 %v261_v18, %v247_v23 }
  0xb3   :  { %v270_v38 = vmul.f32 %v268_v25, %v266_v30  ;;  %v271_v40 = vmul.f32 %v269_v26, %v266_v30  ;;  %v276_v54 = vmul.f32 %v274_v27, %v266_v30  ;;  %v277_v44 = vmul.f32 %v275_v28, %v266_v30 }
  0xb4   :  { %875 = vset.pattern.permute.xlu1 %v1002_v46  ;;  %v284_v48 = vperm.slane %v230_v63, 3  ;;  %v285_v29 = vperm.slane %v231_v0, 3  ;;  %v290_v49 = vperm.slane %v230_v63, 7  ;;  %v291_v52 = vperm.slane %v231_v0, 7  ;;  %v1230_v2 = vpop.permute.xlu2 %374 }
  0xb5   :  { %v272_v53 = vadd.f32 %v270_v38, %v256_v31  ;;  %v273_v55 = vadd.f32 %v271_v40, %v257_v33  ;;  %v278_v50 = vadd.f32 %v276_v54, %v262_v32  ;;  %v279_v24 = vadd.f32 %v277_v44, %v263_v35  ;;  %734 = vperm.xlu1 %875, %v1027_v3  }
  0xb6   :  { %v286_v51 = vmul.f32 %v284_v48, %v1187_v37  ;;  %v287_v56 = vmul.f32 %v285_v29, %v1187_v37  ;;  %v292_v57 = vmul.f32 %v290_v49, %v1187_v37  ;;  %v293_v59 = vmul.f32 %v291_v52, %v1187_v37 }
  0xb7   :  { %v1003_v0 = vmov 37   ;;  %v378_v23 = vperm.slane %v1029_v4, 0  ;;  %v384_v26 = vperm.slane %v1029_v4, 4  ;;  %v377_v32 = vperm.slane %v1034_v5, 0 }
  0xb8   :  { %v288_v39 = vadd.f32 %v286_v51, %v272_v53  ;;  %v289_v60 = vadd.f32 %v287_v56, %v273_v55  ;;  %v294_v42 = vadd.f32 %v292_v57, %v278_v50  ;;  %v295_v1 = vadd.f32 %v293_v59, %v279_v24  ;;  %876 = vset.pattern.permute.xlu2 %v1003_v0  ;;  %v391_v53 = vpop.permute.xlu0 %390 }
  0xb9   :  { %v297_v63 = vpop.permute.xlu1 %296  ;;  %877 = vset.pattern.permute.xlu0 %v1003_v0  ;;  %752 = vperm.xlu2 %876, %v1027_v3   ;;  %v383_v29 = vperm.slane %v1034_v5, 4  ;;  %v426_v49 = vperm.slane %v1029_v4, 3 }
  0xba   :  { %v301_v37 = vsel %vm300_vm10, %v297_v63, %v1212_v62  ;;  %v302_v9 = vsel %vm300_vm10, %v1212_v62, %v297_v63 }
  0xbb   :  { %v307_v10 = vsel %vm1095_vm0, %v302_v9, 0.0  ;;  %v308_v61 = vsel %vm1103_vm3, %v301_v37, 0.0 }
  0xbc   :  { %v313_v11 = vperm.slane %v307_v10, 0  ;;  %v314_v3 = vperm.slane %v308_v61, 0  ;;  %v319_v13 = vperm.slane %v307_v10, 4  ;;  %v320_v15 = vperm.slane %v308_v61, 4 }
  0xbd   :  { %v1232_v7 = vpop.permute.xlu2 %422  ;;  %v329_v19 = vperm.slane %v307_v10, 1  ;;  %v330_v62 = vperm.slane %v308_v61, 1  ;;  %v335_v21 = vperm.slane %v307_v10, 5  ;;  %v336_v25 = vperm.slane %v308_v61, 5 }
  0xbe   :  { %v315_v16 = vmul.f32 %v313_v11, %v311_v41  ;;  %v316_v17 = vmul.f32 %v314_v3, %v311_v41  ;;  %v321_v18 = vmul.f32 %v319_v13, %v311_v41  ;;  %v322_v22 = vmul.f32 %v320_v15, %v311_v41 }
  0xbf   :  { %v345_v40 = vperm.slane %v307_v10, 2  ;;  %v346_v54 = vperm.slane %v308_v61, 2  ;;  %v351_v44 = vperm.slane %v307_v10, 6  ;;  %v352_v52 = vperm.slane %v308_v61, 6 }
  0xc0   :  { %v317_v31 = vadd.f32 %v315_v16, %v288_v39  ;;  %v318_v33 = vadd.f32 %v316_v17, %v289_v60  ;;  %v323_v38 = vadd.f32 %v321_v18, %v294_v42  ;;  %v324_v48 = vadd.f32 %v322_v22, %v295_v1 }
  0xc1   :  { %v327_v6 = vpop.permute.xlu1 %326  ;;  %v361_v56 = vperm.slane %v307_v10, 3  ;;  %v362_v59 = vperm.slane %v308_v61, 3  ;;  %v367_v39 = vperm.slane %v307_v10, 7  ;;  %v368_v60 = vperm.slane %v308_v61, 7 }
  0xc2   :  { %v331_v27 = vmul.f32 %v329_v19, %v327_v6  ;;  %v332_v28 = vmul.f32 %v330_v62, %v327_v6  ;;  %v337_v30 = vmul.f32 %v335_v21, %v327_v6  ;;  %v338_v35 = vmul.f32 %v336_v25, %v327_v6 }
  0xc3   :  { %v347_v42 = vmul.f32 %v345_v40, %v1222_v47  ;;  %v348_v1 = vmul.f32 %v346_v54, %v1222_v47  ;;  %v353_v63 = vmul.f32 %v351_v44, %v1222_v47  ;;  %v354_v6 = vmul.f32 %v352_v52, %v1222_v47 }
  0xc4   :  { %v333_v50 = vadd.f32 %v331_v27, %v317_v31  ;;  %v334_v24 = vadd.f32 %v332_v28, %v318_v33  ;;  %v339_v51 = vadd.f32 %v337_v30, %v323_v38  ;;  %v340_v57 = vadd.f32 %v338_v35, %v324_v48  ;;  %v1268_v27 = vpop.permute.xlu0 %451 }
  0xc5   :  { %v1241_v12 = vpop.permute.xlu2 %439  ;;  %v379_v3 = vmul.f32 %v377_v32, %v1230_v2  ;;  %v380_v13 = vmul.f32 %v378_v23, %v1230_v2  ;;  %v385_v41 = vmul.f32 %v383_v29, %v1230_v2  ;;  %v393_v17 = vperm.slane %v1034_v5, 1 }
  0xc6   :  { %v349_v10 = vadd.f32 %v347_v42, %v333_v50  ;;  %v350_v61 = vadd.f32 %v348_v1, %v334_v24  ;;  %v355_v15 = vadd.f32 %v353_v63, %v339_v51  ;;  %v356_v16 = vadd.f32 %v354_v6, %v340_v57 }
  0xc7   :  { %v386_v18 = vmul.f32 %v384_v26, %v1230_v2  ;;  %v394_v47 = vperm.slane %v1029_v4, 1  ;;  %v399_v62 = vperm.slane %v1034_v5, 5  ;;  %v400_v25 = vperm.slane %v1029_v4, 5 }
  0xc8   :  { %v432_v28 = vperm.slane %v1029_v4, 7  ;;  %v425_v30 = vperm.slane %v1034_v5, 3  ;;  %v431_v2 = vperm.slane %v1034_v5, 7  ;;  %v409_v26 = vperm.slane %v1034_v5, 2 }
  0xc9   :  { %v395_v31 = vmul.f32 %v393_v17, %v391_v53  ;;  %v410_v33 = vperm.slane %v1029_v4, 2  ;;  %v416_v32 = vperm.slane %v1029_v4, 6  ;;  %v415_v35 = vperm.slane %v1034_v5, 6 }
  0xca   :  { %v359_v8 = vpop.permute.xlu1 %358  ;;  %v396_v54 = vmul.f32 %v394_v47, %v391_v53  ;;  %v401_v44 = vmul.f32 %v399_v62, %v391_v53  ;;  %v402_v50 = vmul.f32 %v400_v25, %v391_v53  ;;  %v427_v24 = vmul.f32 %v425_v30, %v1232_v7 }
  0xcb   :  { %v363_v0 = vmul.f32 %v361_v56, %v359_v8  ;;  %v364_v37 = vmul.f32 %v362_v59, %v359_v8  ;;  %v369_v9 = vmul.f32 %v367_v39, %v359_v8  ;;  %v370_v11 = vmul.f32 %v368_v60, %v359_v8 }
  0xcc   :  { %v428_v53 = vmul.f32 %v426_v49, %v1232_v7  ;;  %v433_v39 = vmul.f32 %v431_v2, %v1232_v7  ;;  %v434_v1 = vmul.f32 %v432_v28, %v1232_v7 }
  0xcd   :  { %v1252_v55 = vpop.permute.xlu2 %483  ;;  %v365_v19 = vadd.f32 %v363_v0, %v349_v10  ;;  %v366_v21 = vadd.f32 %v364_v37, %v350_v61  ;;  %v371_v22 = vadd.f32 %v369_v9, %v355_v15  ;;  %v372_v23 = vadd.f32 %v370_v11, %v356_v16  ;;  %v517_v37 = vpop.permute.xlu0 %516 }
  0xcf   :  { %v381_v40 = vadd.f32 %v379_v3, %v365_v19  ;;  %v382_v48 = vadd.f32 %v380_v13, %v366_v21  ;;  %v388_v29 = vadd.f32 %v386_v18, %v372_v23  ;;  %v387_v52 = vadd.f32 %v385_v41, %v371_v22 }
  0xd1   :  { %v397_v60 = vadd.f32 %v395_v31, %v381_v40  ;;  %v403_v63 = vadd.f32 %v401_v44, %v387_v52  ;;  %v404_v0 = vadd.f32 %v402_v50, %v388_v29 }
  0xd3   :  { %v1243_v14 = vpop.permute.xlu1 %406 }
  0xd4   :  { %v411_v51 = vmul.f32 %v409_v26, %v1243_v14  ;;  %v412_v5 = vmul.f32 %v410_v33, %v1243_v14  ;;  %v417_v56 = vmul.f32 %v415_v35, %v1243_v14  ;;  %v418_v57 = vmul.f32 %v416_v32, %v1243_v14 }
  0xd5   :  { %v515_v38 = vpop.permute.xlu2 %514  ;;  %v398_v14 = vadd.f32 %v396_v54, %v382_v48 }
  0xd6   :  { %v413_v9 = vadd.f32 %v411_v51, %v397_v60  ;;  %v520_v7 = vsel %vm518_vm13, %v517_v37, %v515_v38  ;;  %v419_v49 = vadd.f32 %v417_v56, %v403_v63  ;;  %v420_v11 = vadd.f32 %v418_v57, %v404_v0 }
  0xd7   :  { %v1318_v61 = vsel %vm522_vm14, %v520_v7, 0.0 }
  0xd8   :  { %v436_v18 = vadd.f32 %v434_v1, %v420_v11  ;;  %v429_v19 = vadd.f32 %v427_v24, %v413_v9  ;;  %v435_v47 = vadd.f32 %v433_v39, %v419_v49  ;;  %v534_v21 = vperm.slane %v1318_v61, 0 }
  0xd9   :  { %v540_v23 = vperm.slane %v1318_v61, 4  ;;  %v550_v54 = vperm.slane %v1318_v61, 1  ;;  %v556_v52 = vperm.slane %v1318_v61, 5 }
  0xdb   :  { %v1248_v46 = vpop.permute.xlu1 %437 }
  0xdc   :  { %v443_v59 = vsel %vm441_vm11, %v1241_v12, %v1248_v46  ;;  %v442_v42 = vsel %vm441_vm11, %v1248_v46, %v1241_v12  ;;  %v519_v12 = vsel %vm518_vm13, %v515_v38, %v517_v37  ;;  %v414_v46 = vadd.f32 %v412_v5, %v398_v14 }
  0xdd   :  { %v449_v4 = vsel %vm1202_vm8, %v443_v59, 0.0  ;;  %v448_v3 = vsel %vm1195_vm6, %v442_v42, 0.0  ;;  %v1312_v10 = vpop.permute.xlu2 %546  ;;  %v1316_v45 = vsel %vm1095_vm0, %v519_v12, 0.0  ;;  %vm674_vm0 = vcmp.lt.s32.totalorder %v1081_v34, 111 }
  0xde   :  { %v455_v13 = vperm.slane %v449_v4, 0  ;;  %v461_v41 = vperm.slane %v449_v4, 4  ;;  %v454_v15 = vperm.slane %v448_v3, 0  ;;  %v460_v16 = vperm.slane %v448_v3, 4 }
  0xdf   :  { %v430_v17 = vadd.f32 %v428_v53, %v414_v46  ;;  %v533_v62 = vperm.slane %v1316_v45, 0  ;;  %v539_v22 = vperm.slane %v1316_v45, 4  ;;  %v471_v28 = vperm.slane %v449_v4, 1 }
  0xe0   :  { %v457_v43 = vmul.f32 %v455_v13, %v1268_v27  ;;  %v463_v25 = vmul.f32 %v461_v41, %v1268_v27  ;;  %v477_v30 = vperm.slane %v449_v4, 5  ;;  %v456_v2 = vmul.f32 %v454_v15, %v1268_v27 }
  0xe1   :  { %v462_v26 = vmul.f32 %v460_v16, %v1268_v27  ;;  %v470_v31 = vperm.slane %v448_v3, 1  ;;  %v476_v33 = vperm.slane %v448_v3, 5  ;;  %v549_v40 = vperm.slane %v1316_v45, 1 }
  0xe2   :  { %v555_v29 = vperm.slane %v1316_v45, 5  ;;  %v459_v27 = vadd.f32 %v457_v43, %v430_v17  ;;  %v465_v50 = vadd.f32 %v463_v25, %v436_v18  ;;  %v487_v24 = vperm.slane %v449_v4, 2 }
  0xe3   :  { %v1265_v8 = vpop.permute.xlu1 %467  ;;  %v493_v51 = vperm.slane %v449_v4, 6  ;;  %v458_v5 = vadd.f32 %v456_v2, %v429_v19  ;;  %v464_v56 = vadd.f32 %v462_v26, %v435_v47  ;;  %v486_v57 = vperm.slane %v448_v3, 2 }
  0xe4   :  { %v473_v35 = vmul.f32 %v471_v28, %v1265_v8  ;;  %v479_v38 = vmul.f32 %v477_v30, %v1265_v8  ;;  %v472_v44 = vmul.f32 %v470_v31, %v1265_v8  ;;  %v478_v48 = vmul.f32 %v476_v33, %v1265_v8  ;;  %v563_v31 = vpop.permute.xlu0 %562 }
  0xe5   :  { %v492_v59 = vperm.slane %v448_v3, 6  ;;  %v503_v60 = vperm.slane %v449_v4, 3  ;;  %v509_v42 = vperm.slane %v449_v4, 7  ;;  %v594_v1 = vpop.permute.xlu2 %593  ;;  %v502_v8 = vperm.slane %v448_v3, 3 }
  0xe6   :  { %v475_v53 = vadd.f32 %v473_v35, %v459_v27  ;;  %v481_v39 = vadd.f32 %v479_v38, %v465_v50  ;;  %v474_v14 = vadd.f32 %v472_v44, %v458_v5  ;;  %v480_v63 = vadd.f32 %v478_v48, %v464_v56 }
  0xe7   :  { %v508_v0 = vperm.slane %v448_v3, 7  ;;  %v489_v37 = vmul.f32 %v487_v24, %v1252_v55  ;;  %v495_v9 = vmul.f32 %v493_v51, %v1252_v55  ;;  %v488_v46 = vmul.f32 %v486_v57, %v1252_v55 }
  0xe8   :  { %v494_v49 = vmul.f32 %v492_v59, %v1252_v55  ;;  %v565_v28 = vperm.slane %v1316_v45, 2  ;;  %v566_v30 = vperm.slane %v1318_v61, 2  ;;  %v571_v26 = vperm.slane %v1316_v45, 6 }
  0xe9   :  { %v491_v13 = vadd.f32 %v489_v37, %v475_v53  ;;  %v497_v41 = vadd.f32 %v495_v9, %v481_v39  ;;  %v490_v17 = vadd.f32 %v488_v46, %v474_v14  ;;  %v551_v33 = vmul.f32 %v549_v40, %v1312_v10 }
  0xea   :  { %v496_v18 = vadd.f32 %v494_v49, %v480_v63  ;;  %v558_v38 = vmul.f32 %v556_v52, %v1312_v10  ;;  %v567_v44 = vmul.f32 %v565_v28, %v563_v31  ;;  %v568_v48 = vmul.f32 %v566_v30, %v563_v31 }
  0xeb   :  { %v573_v50 = vmul.f32 %v571_v26, %v563_v31  ;;  %v581_v51 = vperm.slane %v1316_v45, 3  ;;  %v582_v5 = vperm.slane %v1318_v61, 3  ;;  %v587_v57 = vperm.slane %v1316_v45, 7 }
  0xec   :  { %v1298_v6 = vpop.permute.xlu1 %499 }
  0xed   :  { %v505_v12 = vmul.f32 %v503_v60, %v1298_v6  ;;  %v511_v7 = vmul.f32 %v509_v42, %v1298_v6  ;;  %v504_v11 = vmul.f32 %v502_v8, %v1298_v6  ;;  %v510_v4 = vmul.f32 %v508_v0, %v1298_v6  ;;  %v608_v27 = vpop.permute.xlu2 %607 }
  0xee   :  { %v572_v6 = vperm.slane %v1318_v61, 6 }
  0xef   :  { %v507_v43 = vadd.f32 %v505_v12, %v491_v13  ;;  %v513_v25 = vadd.f32 %v511_v7, %v497_v41  ;;  %v506_v55 = vadd.f32 %v504_v11, %v490_v17  ;;  %v512_v2 = vadd.f32 %v510_v4, %v496_v18 }
  0xf0   :  { %v574_v24 = vmul.f32 %v572_v6, %v563_v31 }
  0xf5   :  { %v531_v32 = vpop.permute.xlu1 %530 }
  0xf6   :  { %v536_v15 = vmul.f32 %v534_v21, %v531_v32  ;;  %v542_v3 = vmul.f32 %v540_v23, %v531_v32  ;;  %v535_v19 = vmul.f32 %v533_v62, %v531_v32  ;;  %v541_v47 = vmul.f32 %v539_v22, %v531_v32 }
  0xf7   :  { %v552_v22 = vmul.f32 %v550_v54, %v1312_v10  ;;  %v557_v32 = vmul.f32 %v555_v29, %v1312_v10  ;;  %v588_v54 = vperm.slane %v1318_v61, 7 }
  0xf8   :  { %v538_v21 = vadd.f32 %v536_v15, %v507_v43  ;;  %v544_v23 = vadd.f32 %v542_v3, %v513_v25  ;;  %v537_v35 = vadd.f32 %v535_v19, %v506_v55  ;;  %v543_v62 = vadd.f32 %v541_v47, %v512_v2  ;;  %v671_v3 = vpop.permute.xlu2 %670  ;;  %v624_v43 = vpop.permute.xlu0 %623 }
  0xfa   :  { %v554_v40 = vadd.f32 %v552_v22, %v538_v21  ;;  %v560_v56 = vadd.f32 %v558_v38, %v544_v23  ;;  %v553_v59 = vadd.f32 %v551_v33, %v537_v35  ;;  %v559_v10 = vadd.f32 %v557_v32, %v543_v62 }
  0xfc   :  { %v569_v37 = vadd.f32 %v567_v44, %v553_v59  ;;  %v570_v9 = vadd.f32 %v568_v48, %v554_v40  ;;  %v575_v12 = vadd.f32 %v573_v50, %v559_v10 }
  0xfe   :  { %v579_v16 = vpop.permute.xlu1 %578 }
  0xff   :  { %v583_v39 = vmul.f32 %v581_v51, %v579_v16  ;;  %v584_v60 = vmul.f32 %v582_v5, %v579_v16  ;;  %v589_v63 = vmul.f32 %v587_v57, %v579_v16  ;;  %v590_v8 = vmul.f32 %v588_v54, %v579_v16 }
 0x101   :  { %v585_v4 = vadd.f32 %v583_v39, %v569_v37  ;;  %v586_v13 = vadd.f32 %v584_v60, %v570_v9  ;;  %v591_v41 = vadd.f32 %v589_v63, %v575_v12  ;;  %v687_v39 = vpop.permute.xlu0 %686 }
 0x106   :  { %v596_v29 = vpop.permute.xlu1 %595 }
 0x107   :  { %v1357_v52 = vsel %vm597_vm15, %v594_v1, %v596_v29  ;;  %v599_v53 = vsel %vm597_vm15, %v596_v29, %v594_v1  ;;  %v576_v1 = vadd.f32 %v574_v24, %v560_v56  ;;  %v656_v29 = vpop.permute.xlu2 %655 }
 0x108   :  { %v1361_v42 = vsel %vm52_vm12, %v599_v53, 0.0  ;;  %v610_v14 = vperm.slane %v1357_v52, 0  ;;  %v616_v61 = vperm.slane %v1357_v52, 4  ;;  %v626_v16 = vperm.slane %v1357_v52, 1 }
 0x109   :  { %v611_v45 = vperm.slane %v1361_v42, 0  ;;  %v617_v0 = vperm.slane %v1361_v42, 4  ;;  %v592_v15 = vadd.f32 %v590_v8, %v576_v1  ;;  %v627_v17 = vperm.slane %v1361_v42, 1 }
 0x10a   :  { %v612_v7 = vmul.f32 %v610_v14, %v608_v27  ;;  %v618_v49 = vmul.f32 %v616_v61, %v608_v27  ;;  %v632_v18 = vperm.slane %v1357_v52, 5  ;;  %v633_v19 = vperm.slane %v1361_v42, 5 }
 0x10b   :  { %v613_v46 = vmul.f32 %v611_v45, %v608_v27  ;;  %v619_v11 = vmul.f32 %v617_v0, %v608_v27  ;;  %v628_v2 = vmul.f32 %v626_v16, %v624_v43  ;;  %v629_v26 = vmul.f32 %v627_v17, %v624_v43 }
 0x10c   :  { %v614_v30 = vadd.f32 %v612_v7, %v585_v4  ;;  %v620_v55 = vadd.f32 %v618_v49, %v591_v41  ;;  %v634_v6 = vmul.f32 %v632_v18, %v624_v43  ;;  %v635_v31 = vmul.f32 %v633_v19, %v624_v43 }
 0x10d   :  { %v615_v25 = vadd.f32 %v613_v46, %v586_v13  ;;  %v621_v28 = vadd.f32 %v619_v11, %v592_v15  ;;  %v642_v21 = vperm.slane %v1357_v52, 2  ;;  %v643_v23 = vperm.slane %v1361_v42, 2 }
 0x10e   :  { %v640_v47 = vpop.permute.xlu1 %639  ;;  %v648_v33 = vperm.slane %v1357_v52, 6  ;;  %v649_v35 = vperm.slane %v1361_v42, 6  ;;  %v630_v62 = vadd.f32 %v628_v2, %v614_v30  ;;  %v636_v32 = vadd.f32 %v634_v6, %v620_v55 }
 0x10f   :  { %v631_v22 = vadd.f32 %v629_v26, %v615_v25  ;;  %v637_v38 = vadd.f32 %v635_v31, %v621_v28  ;;  %v644_v44 = vmul.f32 %v642_v21, %v640_v47  ;;  %v645_v48 = vmul.f32 %v643_v23, %v640_v47  ;;  %v719_v2 = vpop.permute.xlu2 %718 }
 0x110   :  { %v650_v27 = vmul.f32 %v648_v33, %v640_v47  ;;  %v651_v50 = vmul.f32 %v649_v35, %v640_v47  ;;  %v658_v24 = vperm.slane %v1357_v52, 3  ;;  %v664_v51 = vperm.slane %v1357_v52, 7 }
 0x111   :  { %v659_v40 = vperm.slane %v1361_v42, 3  ;;  %v665_v56 = vperm.slane %v1361_v42, 7  ;;  %v646_v59 = vadd.f32 %v644_v44, %v630_v62  ;;  %v647_v10 = vadd.f32 %v645_v48, %v631_v22 }
 0x112   :  { %v652_v53 = vadd.f32 %v650_v27, %v636_v32  ;;  %v653_v52 = vadd.f32 %v651_v50, %v637_v38  ;;  %v660_v8 = vmul.f32 %v658_v24, %v656_v29  ;;  %v666_v61 = vmul.f32 %v664_v51, %v656_v29 }
 0x113   :  { %v661_v45 = vmul.f32 %v659_v40, %v656_v29  ;;  %v667_v0 = vmul.f32 %v665_v56, %v656_v29 }
 0x114   :  { %v662_v4 = vadd.f32 %v660_v8, %v646_v59  ;;  %v668_v13 = vadd.f32 %v666_v61, %v652_v53 }
 0x115   :  { %v663_v49 = vadd.f32 %v661_v45, %v647_v10  ;;  %v669_v11 = vadd.f32 %v667_v0, %v653_v52 }
 0x116   :  { %v673_v5 = vpop.permute.xlu1 %672 }
 0x117   :  { %v675_v57 = vsel %vm674_vm0, %v671_v3, %v673_v5  ;;  %v676_v54 = vsel %vm674_vm0, %v673_v5, %v671_v3  ;;  %v753_v53 = vpop.permute.xlu2 %752 }
 0x118   :  { %v683_v36 = vsel %vm1195_vm6, %v675_v57, 0.0  ;;  %v684_v58 = vsel %vm678_vm1, %v676_v54, 0.0 }
 0x119   :  { %v689_v60 = vperm.slane %v683_v36, 0  ;;  %v690_v14 = vperm.slane %v684_v58, 0  ;;  %v695_v63 = vperm.slane %v683_v36, 4  ;;  %v696_v42 = vperm.slane %v684_v58, 4 }
 0x11a   :  { %v705_v20 = vperm.slane %v683_v36, 1  ;;  %v706_v1 = vperm.slane %v684_v58, 1  ;;  %v711_v7 = vperm.slane %v683_v36, 5  ;;  %v712_v46 = vperm.slane %v684_v58, 5 }
 0x11b   :  { %v691_v34 = vmul.f32 %v689_v60, %v687_v39  ;;  %v692_v37 = vmul.f32 %v690_v14, %v687_v39  ;;  %v697_v9 = vmul.f32 %v695_v63, %v687_v39  ;;  %v698_v12 = vmul.f32 %v696_v42, %v687_v39 }
 0x11c   :  { %v721_v18 = vperm.slane %v683_v36, 2  ;;  %v722_v19 = vperm.slane %v684_v58, 2  ;;  %v727_v47 = vperm.slane %v683_v36, 6  ;;  %v728_v43 = vperm.slane %v684_v58, 6 }
 0x11d   :  { %v693_v25 = vadd.f32 %v691_v34, %v662_v4  ;;  %v694_v28 = vadd.f32 %v692_v37, %v663_v49  ;;  %v699_v30 = vadd.f32 %v697_v9, %v668_v13  ;;  %v700_v55 = vadd.f32 %v698_v12, %v669_v11 }
 0x11e   :  { %v703_v41 = vpop.permute.xlu1 %702  ;;  %v723_v23 = vmul.f32 %v721_v18, %v719_v2  ;;  %v724_v33 = vmul.f32 %v722_v19, %v719_v2  ;;  %v729_v35 = vmul.f32 %v727_v47, %v719_v2  ;;  %v730_v62 = vmul.f32 %v728_v43, %v719_v2 }
 0x11f   :  { %v707_v15 = vmul.f32 %v705_v20, %v703_v41  ;;  %v708_v3 = vmul.f32 %v706_v1, %v703_v41  ;;  %v713_v16 = vmul.f32 %v711_v7, %v703_v41  ;;  %v714_v17 = vmul.f32 %v712_v46, %v703_v41 }
 0x120   :  { %v737_v22 = vperm.slane %v683_v36, 3  ;;  %v738_v32 = vperm.slane %v684_v58, 3  ;;  %v743_v38 = vperm.slane %v683_v36, 7  ;;  %v744_v44 = vperm.slane %v684_v58, 7 }
 0x121   :  { %v709_v26 = vadd.f32 %v707_v15, %v693_v25  ;;  %v710_v6 = vadd.f32 %v708_v3, %v694_v28  ;;  %v715_v31 = vadd.f32 %v713_v16, %v699_v30  ;;  %v716_v21 = vadd.f32 %v714_v17, %v700_v55 }
 0x123   :  { %v725_v27 = vadd.f32 %v723_v23, %v709_v26  ;;  %v726_v50 = vadd.f32 %v724_v33, %v710_v6  ;;  %v731_v24 = vadd.f32 %v729_v35, %v715_v31  ;;  %v732_v51 = vadd.f32 %v730_v62, %v716_v21 }
 0x127   :  { %v735_v48 = vpop.permute.xlu1 %734 }
 0x128   :  { %v739_v5 = vmul.f32 %v737_v22, %v735_v48  ;;  %v740_v40 = vmul.f32 %v738_v32, %v735_v48  ;;  %v745_v56 = vmul.f32 %v743_v38, %v735_v48  ;;  %v746_v57 = vmul.f32 %v744_v44, %v735_v48 }
 0x12a   :  { %v741_v54 = vadd.f32 %v739_v5, %v725_v27  ;;  %v742_v29 = vadd.f32 %v740_v40, %v726_v50  ;;  %v747_v59 = vadd.f32 %v745_v56, %v731_v24  ;;  %v748_v10 = vadd.f32 %v746_v57, %v732_v51 }
 0x12c   :  { %vm749_vm2 = vcmp.ge.f32.partialorder %v741_v54, 0.0  ;;  %vm750_vm3 = vcmp.ge.f32.partialorder %v742_v29, 0.0  ;;  %vm761_vm4 = vcmp.ge.f32.partialorder %v747_v59, 0.0  ;;  %vm762_vm5 = vcmp.ge.f32.partialorder %v748_v10, 0.0 }
 0x12d   :  { %v755_v36 = vmul.f32 %v753_v53, %v741_v54  ;;  %v756_v58 = vmul.f32 %v753_v53, %v742_v29  ;;  %v763_v52 = vmul.f32 %v753_v53, %v747_v59  ;;  %v764_v39 = vmul.f32 %v753_v53, %v748_v10 }
 0x12f   :  { %v757_v60 = vsel %vm749_vm2, %v741_v54, %v755_v36  ;;  %v758_v14 = vsel %vm750_vm3, %v742_v29, %v756_v58  ;;  %v765_v63 = vsel %vm761_vm4, %v747_v59, %v763_v52  ;;  %v766_v42 = vsel %vm762_vm5, %v748_v10, %v764_v39 }
 0x130   :  { %759 = vst [vmem:[#allocation7] sm:$0xff] %v757_v60 }
 0x131   :  { %760 = vst [vmem:[#allocation7 + $0x8] sm:$0xff] %v758_v14 }
 0x132   :  { %767 = vst [vmem:[#allocation7 + $0x10] sm:$0xff] %v765_v63 }
 0x133   :  { %768 = vst [vmem:[#allocation7 + $0x18] sm:$0xff] %v766_v42 }
 0x134   :  { %781 = dma.vmem_to_hbm [thread:$0]  %s774_s29, 512, %s776_s27, [#allocation4], %s1005_s30, %s1005_s30, %s964_s1  }
 0x135   :  { %954 = dma.done.wait [#allocation4], 512  }
 0x136   :  { %955 = vsyncadd [#allocation4], 4294966784 }
 0x137   :  { %786 = vsyncpa [#allocation3], 1 }
 0x138   :  { %787 = vsyncpa [#allocation6], 1 }
 0x139   :  { %788 = vsyncpa [#allocation4], 1 }

</bundles_post_ra>
